<compile_context>
chip_gen: v7x
topology: tpu7x:2x2x1
jax: 0.10.0
libtpu: 0.0.40
codegen_flags: <defaults>
</compile_context>

<pallas_src>
import jax
import jax.numpy as jnp
from jax import lax
from jax.experimental import pallas as pl
from jax.experimental.pallas import tpu as pltpu


def _round_up(x, m):
    return (x + m - 1) // m * m


def downsample3d(x_ncdhw, weight, bias):
    """Forward of Downsample3D: Conv3d(C, C, k=3, stride=2, pad=1).

    x_ncdhw : (N, C, D, H, W) float32
    weight  : (Cout, Cin, 3, 3, 3) float32  (PyTorch OIDHW)
    bias    : (Cout,) float32
    returns : (N, Cout, OD, OH, OW) float32
    """
    N, C, D, H, W = x_ncdhw.shape
    Cout, Cin, KD, KH, KW = weight.shape
    assert Cin == C and (KD, KH, KW) == (3, 3, 3)

    OD = (D - 1) // 2 + 1
    OH = (H - 1) // 2 + 1
    OW = (W - 1) // 2 + 1

    Dp = D + 2
    Hpe = _round_up(H + 2, 2)          # padded H, rounded to even for phase split
    Wpe = _round_up(W + 2, 2)
    Hq, Wq = Hpe // 2, Wpe // 2        # per-phase extents (Hq = OH+1, Wq = OW+1)

    MR = _round_up(OH * Wq, 8)         # matmul M rows per grid step (incl. junk rows)
    Lp = _round_up(Wq + 1 + MR, 8)     # padded flattened (Hq*Wq) length
    Cpad = max(128, _round_up(Cout, 128))

    # ---- JAX glue: NCDHW -> NDHWC, conv pad, H/W phase split, flatten -------
    xt = jnp.transpose(x_ncdhw, (0, 2, 3, 4, 1))                    # (N, D, H, W, C)
    xpad = jnp.pad(xt, ((0, 0), (1, 1),
                        (1, Hpe - H - 1), (1, Wpe - W - 1), (0, 0)))
    # phase split: element (n, d, ph, pw, hq, wq, c) == xpad[n, d, 2hq+ph, 2wq+pw, c]
    xe = xpad.reshape(N, Dp, Hq, 2, Wq, 2, C).transpose(0, 1, 3, 5, 2, 4, 6)
    xe = xe.reshape(N * Dp, 2, 2, Hq * Wq, C)
    xq = jnp.pad(xe, ((0, 0), (0, 0), (0, 0), (0, Lp - Hq * Wq), (0, 0)))
    xq = xq.astype(jnp.bfloat16)                                    # (N*Dp, 2, 2, Lp, C)

    # weight (Cout, Cin, kd, kh, kw) -> (kd, kh, kw, Cin, Cout) -> (27, C, Cpad)
    w_mat = jnp.transpose(weight, (2, 3, 4, 1, 0)).reshape(27, C, Cout)
    w_mat = jnp.pad(w_mat, ((0, 0), (0, 0), (0, Cpad - Cout))).astype(jnp.bfloat16)
    b_mat = jnp.pad(bias, (0, Cpad - Cout)).astype(jnp.float32).reshape(1, Cpad)

    # ---- Pallas kernel: fused 27-tap accumulation on the MXU ----------------
    def kernel(v0_ref, v1_ref, v2_ref, w_ref, b_ref, o_ref):
        views = (v0_ref, v1_ref, v2_ref)
        acc = jnp.zeros((MR, Cpad), jnp.float32)
        for kd in range(3):                     # static, fully unrolled (27 taps)
            vref = views[kd]
            for kh in range(3):
                ph, dh = kh % 2, kh // 2
                for kw in range(3):
                    pw, dw = kw % 2, kw // 2
                    base = dh * Wq + dw         # static contiguous row offset
                    a = vref[0, ph, pw, pl.ds(base, MR), :]          # (MR, C) bf16
                    w_tap = w_ref[kd * 9 + kh * 3 + kw]              # (C, Cpad) bf16
                    acc = acc + jnp.dot(a, w_tap,
                                        preferred_element_type=jnp.float32)
        o_ref[0] = acc + b_ref[...]             # fused bias add, f32 out

    view_specs = [
        pl.BlockSpec((1, 2, 2, Lp, C),
                     (lambda n, od, kd=kd: (n * Dp + 2 * od + kd, 0, 0, 0, 0)))
        for kd in range(3)
    ]
    w_spec = pl.BlockSpec((27, C, Cpad), lambda n, od: (0, 0, 0))
    b_spec = pl.BlockSpec((1, Cpad), lambda n, od: (0, 0))
    out_spec = pl.BlockSpec((1, MR, Cpad), lambda n, od: (n * OD + od, 0, 0))

    flops = 2 * N * OD * MR * (27 * C) * Cpad
    bytes_accessed = (N * OD * 3 * (2 * 2 * Lp * C * 2)      # input plane slabs (bf16)
                      + 27 * C * Cpad * 2                    # weight (bf16)
                      + Cpad * 4                             # bias
                      + N * OD * MR * Cpad * 4)              # output (f32)

    y_blocks = pl.pallas_call(
        kernel,
        out_shape=jax.ShapeDtypeStruct((N * OD, MR, Cpad), jnp.float32),
        grid_spec=pltpu.PrefetchScalarGridSpec(
            num_scalar_prefetch=0,
            grid=(N, OD),
            in_specs=[*view_specs, w_spec, b_spec],
            out_specs=out_spec,
        ),
        compiler_params=pltpu.CompilerParams(
            dimension_semantics=("parallel", "parallel"),
            vmem_limit_bytes=32 * 1024 * 1024,
        ),
        cost_estimate=pl.CostEstimate(flops=flops, transcendentals=0,
                                      bytes_accessed=bytes_accessed),
    )(xq, xq, xq, w_mat, b_mat)

    # ---- strip junk rows / padded channels, back to NCDHW -------------------
    y = y_blocks[:, :OH * Wq, :].reshape(N, OD, OH, Wq, Cpad)
    y = y[:, :, :, :OW, :Cout]                                   # (N, OD, OH, OW, Cout)
    return jnp.transpose(y, (0, 4, 1, 2, 3))                     # (N, Cout, OD, OH, OW)


def _reference(x_ncdhw, weight, bias):
    y = lax.conv_general_dilated(
        x_ncdhw, weight,
        window_strides=(2, 2, 2),
        padding=((1, 1), (1, 1), (1, 1)),
        dimension_numbers=("NCDHW", "OIDHW", "NCDHW"))
    return y + bias[None, :, None, None, None]


if __name__ == "__main__":
    key = jax.random.PRNGKey(0)
    kx, kw, kb = jax.random.split(key, 3)

    N, C, D, H, W = 2, 4, 8, 8, 8
    x = jax.random.normal(kx, (N, C, D, H, W), dtype=jnp.float32)

    # deterministic synthetic params (same shapes/init range as nn.Conv3d(C, C, 3))
    fan_in = C * 3 * 3 * 3
    bound = 1.0 / (fan_in ** 0.5)
    weight = jax.random.uniform(kw, (C, C, 3, 3, 3), jnp.float32, -bound, bound)
    bias = jax.random.uniform(kb, (C,), jnp.float32, -bound, bound)

    fwd = jax.jit(downsample3d)
    y = jax.block_until_ready(fwd(x, weight, bias))

    y_ref = _reference(x, weight, bias)
    assert y.shape == y_ref.shape == (N, C, 4, 4, 4), y.shape
    # bf16 MXU operands (f32 accumulation) -> loosened tolerance
    assert jnp.allclose(y, y_ref, atol=2e-2, rtol=2e-2)

    print("KERNEL_OK")
</pallas_src>

<mosaic_0001>
module attributes {stable_mosaic.version = 11 : i64} {
  func.func @kernel(%arg0: i32, %arg1: i32, %arg2: memref<1x2x2x32x4xbf16, #tpu.memory_space<vmem>>, %arg3: memref<1x2x2x32x4xbf16, #tpu.memory_space<vmem>>, %arg4: memref<1x2x2x32x4xbf16, #tpu.memory_space<vmem>>, %arg5: memref<27x4x128xbf16, #tpu.memory_space<vmem>>, %arg6: memref<1x128xf32, #tpu.memory_space<vmem>>, %arg7: memref<1x24x128xf32, #tpu.memory_space<vmem>>) attributes {dimension_semantics = [#tpu.dimension_semantics<parallel>, #tpu.dimension_semantics<parallel>], iteration_bounds = array<i64: 2, 4>, scalar_prefetch = 0 : i64, scratch_operands = 0 : i64, tpu.core_type = #tpu.core_type<tc>, window_params = [{transform_indices = @transform_0, window_bounds = array<i64: 1, 2, 2, 32, 4>}, {transform_indices = @transform_1, window_bounds = array<i64: 1, 2, 2, 32, 4>}, {transform_indices = @transform_2, window_bounds = array<i64: 1, 2, 2, 32, 4>}, {pipeline_mode = #tpu.pipeline_mode<synchronous>, transform_indices = @transform_3, window_bounds = array<i64: 27, 4, 128>}, {pipeline_mode = #tpu.pipeline_mode<synchronous>, transform_indices = @transform_4, window_bounds = array<i64: 1, 128>}, {transform_indices = @transform_5, window_bounds = array<i64: 1, 24, 128>}]} {
    %cst = arith.constant 0.000000e+00 : f32
    %0 = vector.broadcast %cst : f32 to vector<24x128xf32>
    %c0 = arith.constant 0 : index
    %c0_0 = arith.constant 0 : index
    %c0_1 = arith.constant 0 : index
    %c0_2 = arith.constant 0 : index
    %c0_3 = arith.constant 0 : index
    %1 = vector.load %arg2[%c0, %c0_0, %c0_1, %c0_2, %c0_3] : memref<1x2x2x32x4xbf16, #tpu.memory_space<vmem>>, vector<1x1x1x24x4xbf16>
    %2 = vector.shape_cast %1 : vector<1x1x1x24x4xbf16> to vector<24x4xbf16>
    %c0_4 = arith.constant 0 : index
    %c0_5 = arith.constant 0 : index
    %c0_6 = arith.constant 0 : index
    %3 = vector.load %arg5[%c0_4, %c0_5, %c0_6] : memref<27x4x128xbf16, #tpu.memory_space<vmem>>, vector<1x4x128xbf16>
    %4 = vector.shape_cast %3 : vector<1x4x128xbf16> to vector<4x128xbf16>
    %cst_7 = arith.constant dense<0.000000e+00> : vector<24x128xf32>
    %5 = tpu.matmul %2, %4, %cst_7 {dimension_numbers = #tpu.dot_dimension_numbers<[1], [0], [0], [1], [0, 0, 1, 1], [], []>} : vector<24x4xbf16>, vector<4x128xbf16>, vector<24x128xf32> -> vector<24x128xf32>
    %6 = arith.addf %0, %5 : vector<24x128xf32>
    %c0_8 = arith.constant 0 : index
    %c0_9 = arith.constant 0 : index
    %c1 = arith.constant 1 : index
    %c0_10 = arith.constant 0 : index
    %c0_11 = arith.constant 0 : index
    %7 = vector.load %arg2[%c0_8, %c0_9, %c1, %c0_10, %c0_11] : memref<1x2x2x32x4xbf16, #tpu.memory_space<vmem>>, vector<1x1x1x24x4xbf16>
    %8 = vector.shape_cast %7 : vector<1x1x1x24x4xbf16> to vector<24x4xbf16>
    %c1_12 = arith.constant 1 : index
    %c0_13 = arith.constant 0 : index
    %c0_14 = arith.constant 0 : index
    %9 = vector.load %arg5[%c1_12, %c0_13, %c0_14] : memref<27x4x128xbf16, #tpu.memory_space<vmem>>, vector<1x4x128xbf16>
    %10 = vector.shape_cast %9 : vector<1x4x128xbf16> to vector<4x128xbf16>
    %cst_15 = arith.constant dense<0.000000e+00> : vector<24x128xf32>
    %11 = tpu.matmul %8, %10, %cst_15 {dimension_numbers = #tpu.dot_dimension_numbers<[1], [0], [0], [1], [0, 0, 1, 1], [], []>} : vector<24x4xbf16>, vector<4x128xbf16>, vector<24x128xf32> -> vector<24x128xf32>
    %12 = arith.addf %6, %11 : vector<24x128xf32>
    %c0_16 = arith.constant 0 : index
    %c0_17 = arith.constant 0 : index
    %c0_18 = arith.constant 0 : index
    %c1_19 = arith.constant 1 : index
    %c0_20 = arith.constant 0 : index
    %13 = vector.load %arg2[%c0_16, %c0_17, %c0_18, %c1_19, %c0_20] : memref<1x2x2x32x4xbf16, #tpu.memory_space<vmem>>, vector<1x1x1x24x4xbf16>
    %14 = vector.shape_cast %13 : vector<1x1x1x24x4xbf16> to vector<24x4xbf16>
    %c2 = arith.constant 2 : index
    %c0_21 = arith.constant 0 : index
    %c0_22 = arith.constant 0 : index
    %15 = vector.load %arg5[%c2, %c0_21, %c0_22] : memref<27x4x128xbf16, #tpu.memory_space<vmem>>, vector<1x4x128xbf16>
    %16 = vector.shape_cast %15 : vector<1x4x128xbf16> to vector<4x128xbf16>
    %cst_23 = arith.constant dense<0.000000e+00> : vector<24x128xf32>
    %17 = tpu.matmul %14, %16, %cst_23 {dimension_numbers = #tpu.dot_dimension_numbers<[1], [0], [0], [1], [0, 0, 1, 1], [], []>} : vector<24x4xbf16>, vector<4x128xbf16>, vector<24x128xf32> -> vector<24x128xf32>
    %18 = arith.addf %12, %17 : vector<24x128xf32>
    %c0_24 = arith.constant 0 : index
    %c1_25 = arith.constant 1 : index
    %c0_26 = arith.constant 0 : index
    %c0_27 = arith.constant 0 : index
    %c0_28 = arith.constant 0 : index
    %19 = vector.load %arg2[%c0_24, %c1_25, %c0_26, %c0_27, %c0_28] : memref<1x2x2x32x4xbf16, #tpu.memory_space<vmem>>, vector<1x1x1x24x4xbf16>
    %20 = vector.shape_cast %19 : vector<1x1x1x24x4xbf16> to vector<24x4xbf16>
    %c3 = arith.constant 3 : index
    %c0_29 = arith.constant 0 : index
    %c0_30 = arith.constant 0 : index
    %21 = vector.load %arg5[%c3, %c0_29, %c0_30] : memref<27x4x128xbf16, #tpu.memory_space<vmem>>, vector<1x4x128xbf16>
    %22 = vector.shape_cast %21 : vector<1x4x128xbf16> to vector<4x128xbf16>
    %cst_31 = arith.constant dense<0.000000e+00> : vector<24x128xf32>
    %23 = tpu.matmul %20, %22, %cst_31 {dimension_numbers = #tpu.dot_dimension_numbers<[1], [0], [0], [1], [0, 0, 1, 1], [], []>} : vector<24x4xbf16>, vector<4x128xbf16>, vector<24x128xf32> -> vector<24x128xf32>
    %24 = arith.addf %18, %23 : vector<24x128xf32>
    %c0_32 = arith.constant 0 : index
    %c1_33 = arith.constant 1 : index
    %c1_34 = arith.constant 1 : index
    %c0_35 = arith.constant 0 : index
    %c0_36 = arith.constant 0 : index
    %25 = vector.load %arg2[%c0_32, %c1_33, %c1_34, %c0_35, %c0_36] : memref<1x2x2x32x4xbf16, #tpu.memory_space<vmem>>, vector<1x1x1x24x4xbf16>
    %26 = vector.shape_cast %25 : vector<1x1x1x24x4xbf16> to vector<24x4xbf16>
    %c4 = arith.constant 4 : index
    %c0_37 = arith.constant 0 : index
    %c0_38 = arith.constant 0 : index
    %27 = vector.load %arg5[%c4, %c0_37, %c0_38] : memref<27x4x128xbf16, #tpu.memory_space<vmem>>, vector<1x4x128xbf16>
    %28 = vector.shape_cast %27 : vector<1x4x128xbf16> to vector<4x128xbf16>
    %cst_39 = arith.constant dense<0.000000e+00> : vector<24x128xf32>
    %29 = tpu.matmul %26, %28, %cst_39 {dimension_numbers = #tpu.dot_dimension_numbers<[1], [0], [0], [1], [0, 0, 1, 1], [], []>} : vector<24x4xbf16>, vector<4x128xbf16>, vector<24x128xf32> -> vector<24x128xf32>
    %30 = arith.addf %24, %29 : vector<24x128xf32>
    %c0_40 = arith.constant 0 : index
    %c1_41 = arith.constant 1 : index
    %c0_42 = arith.constant 0 : index
    %c1_43 = arith.constant 1 : index
    %c0_44 = arith.constant 0 : index
    %31 = vector.load %arg2[%c0_40, %c1_41, %c0_42, %c1_43, %c0_44] : memref<1x2x2x32x4xbf16, #tpu.memory_space<vmem>>, vector<1x1x1x24x4xbf16>
    %32 = vector.shape_cast %31 : vector<1x1x1x24x4xbf16> to vector<24x4xbf16>
    %c5 = arith.constant 5 : index
    %c0_45 = arith.constant 0 : index
    %c0_46 = arith.constant 0 : index
    %33 = vector.load %arg5[%c5, %c0_45, %c0_46] : memref<27x4x128xbf16, #tpu.memory_space<vmem>>, vector<1x4x128xbf16>
    %34 = vector.shape_cast %33 : vector<1x4x128xbf16> to vector<4x128xbf16>
    %cst_47 = arith.constant dense<0.000000e+00> : vector<24x128xf32>
    %35 = tpu.matmul %32, %34, %cst_47 {dimension_numbers = #tpu.dot_dimension_numbers<[1], [0], [0], [1], [0, 0, 1, 1], [], []>} : vector<24x4xbf16>, vector<4x128xbf16>, vector<24x128xf32> -> vector<24x128xf32>
    %36 = arith.addf %30, %35 : vector<24x128xf32>
    %c0_48 = arith.constant 0 : index
    %c0_49 = arith.constant 0 : index
    %c0_50 = arith.constant 0 : index
    %c5_51 = arith.constant 5 : index
    %c0_52 = arith.constant 0 : index
    %37 = vector.load %arg2[%c0_48, %c0_49, %c0_50, %c5_51, %c0_52] : memref<1x2x2x32x4xbf16, #tpu.memory_space<vmem>>, vector<1x1x1x24x4xbf16>
    %38 = vector.shape_cast %37 : vector<1x1x1x24x4xbf16> to vector<24x4xbf16>
    %c6 = arith.constant 6 : index
    %c0_53 = arith.constant 0 : index
    %c0_54 = arith.constant 0 : index
    %39 = vector.load %arg5[%c6, %c0_53, %c0_54] : memref<27x4x128xbf16, #tpu.memory_space<vmem>>, vector<1x4x128xbf16>
    %40 = vector.shape_cast %39 : vector<1x4x128xbf16> to vector<4x128xbf16>
    %cst_55 = arith.constant dense<0.000000e+00> : vector<24x128xf32>
    %41 = tpu.matmul %38, %40, %cst_55 {dimension_numbers = #tpu.dot_dimension_numbers<[1], [0], [0], [1], [0, 0, 1, 1], [], []>} : vector<24x4xbf16>, vector<4x128xbf16>, vector<24x128xf32> -> vector<24x128xf32>
    %42 = arith.addf %36, %41 : vector<24x128xf32>
    %c0_56 = arith.constant 0 : index
    %c0_57 = arith.constant 0 : index
    %c1_58 = arith.constant 1 : index
    %c5_59 = arith.constant 5 : index
    %c0_60 = arith.constant 0 : index
    %43 = vector.load %arg2[%c0_56, %c0_57, %c1_58, %c5_59, %c0_60] : memref<1x2x2x32x4xbf16, #tpu.memory_space<vmem>>, vector<1x1x1x24x4xbf16>
    %44 = vector.shape_cast %43 : vector<1x1x1x24x4xbf16> to vector<24x4xbf16>
    %c7 = arith.constant 7 : index
    %c0_61 = arith.constant 0 : index
    %c0_62 = arith.constant 0 : index
    %45 = vector.load %arg5[%c7, %c0_61, %c0_62] : memref<27x4x128xbf16, #tpu.memory_space<vmem>>, vector<1x4x128xbf16>
    %46 = vector.shape_cast %45 : vector<1x4x128xbf16> to vector<4x128xbf16>
    %cst_63 = arith.constant dense<0.000000e+00> : vector<24x128xf32>
    %47 = tpu.matmul %44, %46, %cst_63 {dimension_numbers = #tpu.dot_dimension_numbers<[1], [0], [0], [1], [0, 0, 1, 1], [], []>} : vector<24x4xbf16>, vector<4x128xbf16>, vector<24x128xf32> -> vector<24x128xf32>
    %48 = arith.addf %42, %47 : vector<24x128xf32>
    %c0_64 = arith.constant 0 : index
    %c0_65 = arith.constant 0 : index
    %c0_66 = arith.constant 0 : index
    %c6_67 = arith.constant 6 : index
    %c0_68 = arith.constant 0 : index
    %49 = vector.load %arg2[%c0_64, %c0_65, %c0_66, %c6_67, %c0_68] : memref<1x2x2x32x4xbf16, #tpu.memory_space<vmem>>, vector<1x1x1x24x4xbf16>
    %50 = vector.shape_cast %49 : vector<1x1x1x24x4xbf16> to vector<24x4xbf16>
    %c8 = arith.constant 8 : index
    %c0_69 = arith.constant 0 : index
    %c0_70 = arith.constant 0 : index
    %51 = vector.load %arg5[%c8, %c0_69, %c0_70] : memref<27x4x128xbf16, #tpu.memory_space<vmem>>, vector<1x4x128xbf16>
    %52 = vector.shape_cast %51 : vector<1x4x128xbf16> to vector<4x128xbf16>
    %cst_71 = arith.constant dense<0.000000e+00> : vector<24x128xf32>
    %53 = tpu.matmul %50, %52, %cst_71 {dimension_numbers = #tpu.dot_dimension_numbers<[1], [0], [0], [1], [0, 0, 1, 1], [], []>} : vector<24x4xbf16>, vector<4x128xbf16>, vector<24x128xf32> -> vector<24x128xf32>
    %54 = arith.addf %48, %53 : vector<24x128xf32>
    %c0_72 = arith.constant 0 : index
    %c0_73 = arith.constant 0 : index
    %c0_74 = arith.constant 0 : index
    %c0_75 = arith.constant 0 : index
    %c0_76 = arith.constant 0 : index
    %55 = vector.load %arg3[%c0_72, %c0_73, %c0_74, %c0_75, %c0_76] : memref<1x2x2x32x4xbf16, #tpu.memory_space<vmem>>, vector<1x1x1x24x4xbf16>
    %56 = vector.shape_cast %55 : vector<1x1x1x24x4xbf16> to vector<24x4xbf16>
    %c9 = arith.constant 9 : index
    %c0_77 = arith.constant 0 : index
    %c0_78 = arith.constant 0 : index
    %57 = vector.load %arg5[%c9, %c0_77, %c0_78] : memref<27x4x128xbf16, #tpu.memory_space<vmem>>, vector<1x4x128xbf16>
    %58 = vector.shape_cast %57 : vector<1x4x128xbf16> to vector<4x128xbf16>
    %cst_79 = arith.constant dense<0.000000e+00> : vector<24x128xf32>
    %59 = tpu.matmul %56, %58, %cst_79 {dimension_numbers = #tpu.dot_dimension_numbers<[1], [0], [0], [1], [0, 0, 1, 1], [], []>} : vector<24x4xbf16>, vector<4x128xbf16>, vector<24x128xf32> -> vector<24x128xf32>
    %60 = arith.addf %54, %59 : vector<24x128xf32>
    %c0_80 = arith.constant 0 : index
    %c0_81 = arith.constant 0 : index
    %c1_82 = arith.constant 1 : index
    %c0_83 = arith.constant 0 : index
    %c0_84 = arith.constant 0 : index
    %61 = vector.load %arg3[%c0_80, %c0_81, %c1_82, %c0_83, %c0_84] : memref<1x2x2x32x4xbf16, #tpu.memory_space<vmem>>, vector<1x1x1x24x4xbf16>
    %62 = vector.shape_cast %61 : vector<1x1x1x24x4xbf16> to vector<24x4xbf16>
    %c10 = arith.constant 10 : index
    %c0_85 = arith.constant 0 : index
    %c0_86 = arith.constant 0 : index
    %63 = vector.load %arg5[%c10, %c0_85, %c0_86] : memref<27x4x128xbf16, #tpu.memory_space<vmem>>, vector<1x4x128xbf16>
    %64 = vector.shape_cast %63 : vector<1x4x128xbf16> to vector<4x128xbf16>
    %cst_87 = arith.constant dense<0.000000e+00> : vector<24x128xf32>
    %65 = tpu.matmul %62, %64, %cst_87 {dimension_numbers = #tpu.dot_dimension_numbers<[1], [0], [0], [1], [0, 0, 1, 1], [], []>} : vector<24x4xbf16>, vector<4x128xbf16>, vector<24x128xf32> -> vector<24x128xf32>
    %66 = arith.addf %60, %65 : vector<24x128xf32>
    %c0_88 = arith.constant 0 : index
    %c0_89 = arith.constant 0 : index
    %c0_90 = arith.constant 0 : index
    %c1_91 = arith.constant 1 : index
    %c0_92 = arith.constant 0 : index
    %67 = vector.load %arg3[%c0_88, %c0_89, %c0_90, %c1_91, %c0_92] : memref<1x2x2x32x4xbf16, #tpu.memory_space<vmem>>, vector<1x1x1x24x4xbf16>
    %68 = vector.shape_cast %67 : vector<1x1x1x24x4xbf16> to vector<24x4xbf16>
    %c11 = arith.constant 11 : index
    %c0_93 = arith.constant 0 : index
    %c0_94 = arith.constant 0 : index
    %69 = vector.load %arg5[%c11, %c0_93, %c0_94] : memref<27x4x128xbf16, #tpu.memory_space<vmem>>, vector<1x4x128xbf16>
    %70 = vector.shape_cast %69 : vector<1x4x128xbf16> to vector<4x128xbf16>
    %cst_95 = arith.constant dense<0.000000e+00> : vector<24x128xf32>
    %71 = tpu.matmul %68, %70, %cst_95 {dimension_numbers = #tpu.dot_dimension_numbers<[1], [0], [0], [1], [0, 0, 1, 1], [], []>} : vector<24x4xbf16>, vector<4x128xbf16>, vector<24x128xf32> -> vector<24x128xf32>
    %72 = arith.addf %66, %71 : vector<24x128xf32>
    %c0_96 = arith.constant 0 : index
    %c1_97 = arith.constant 1 : index
    %c0_98 = arith.constant 0 : index
    %c0_99 = arith.constant 0 : index
    %c0_100 = arith.constant 0 : index
    %73 = vector.load %arg3[%c0_96, %c1_97, %c0_98, %c0_99, %c0_100] : memref<1x2x2x32x4xbf16, #tpu.memory_space<vmem>>, vector<1x1x1x24x4xbf16>
    %74 = vector.shape_cast %73 : vector<1x1x1x24x4xbf16> to vector<24x4xbf16>
    %c12 = arith.constant 12 : index
    %c0_101 = arith.constant 0 : index
    %c0_102 = arith.constant 0 : index
    %75 = vector.load %arg5[%c12, %c0_101, %c0_102] : memref<27x4x128xbf16, #tpu.memory_space<vmem>>, vector<1x4x128xbf16>
    %76 = vector.shape_cast %75 : vector<1x4x128xbf16> to vector<4x128xbf16>
    %cst_103 = arith.constant dense<0.000000e+00> : vector<24x128xf32>
    %77 = tpu.matmul %74, %76, %cst_103 {dimension_numbers = #tpu.dot_dimension_numbers<[1], [0], [0], [1], [0, 0, 1, 1], [], []>} : vector<24x4xbf16>, vector<4x128xbf16>, vector<24x128xf32> -> vector<24x128xf32>
    %78 = arith.addf %72, %77 : vector<24x128xf32>
    %c0_104 = arith.constant 0 : index
    %c1_105 = arith.constant 1 : index
    %c1_106 = arith.constant 1 : index
    %c0_107 = arith.constant 0 : index
    %c0_108 = arith.constant 0 : index
    %79 = vector.load %arg3[%c0_104, %c1_105, %c1_106, %c0_107, %c0_108] : memref<1x2x2x32x4xbf16, #tpu.memory_space<vmem>>, vector<1x1x1x24x4xbf16>
    %80 = vector.shape_cast %79 : vector<1x1x1x24x4xbf16> to vector<24x4xbf16>
    %c13 = arith.constant 13 : index
    %c0_109 = arith.constant 0 : index
    %c0_110 = arith.constant 0 : index
    %81 = vector.load %arg5[%c13, %c0_109, %c0_110] : memref<27x4x128xbf16, #tpu.memory_space<vmem>>, vector<1x4x128xbf16>
    %82 = vector.shape_cast %81 : vector<1x4x128xbf16> to vector<4x128xbf16>
    %cst_111 = arith.constant dense<0.000000e+00> : vector<24x128xf32>
    %83 = tpu.matmul %80, %82, %cst_111 {dimension_numbers = #tpu.dot_dimension_numbers<[1], [0], [0], [1], [0, 0, 1, 1], [], []>} : vector<24x4xbf16>, vector<4x128xbf16>, vector<24x128xf32> -> vector<24x128xf32>
    %84 = arith.addf %78, %83 : vector<24x128xf32>
    %c0_112 = arith.constant 0 : index
    %c1_113 = arith.constant 1 : index
    %c0_114 = arith.constant 0 : index
    %c1_115 = arith.constant 1 : index
    %c0_116 = arith.constant 0 : index
    %85 = vector.load %arg3[%c0_112, %c1_113, %c0_114, %c1_115, %c0_116] : memref<1x2x2x32x4xbf16, #tpu.memory_space<vmem>>, vector<1x1x1x24x4xbf16>
    %86 = vector.shape_cast %85 : vector<1x1x1x24x4xbf16> to vector<24x4xbf16>
    %c14 = arith.constant 14 : index
    %c0_117 = arith.constant 0 : index
    %c0_118 = arith.constant 0 : index
    %87 = vector.load %arg5[%c14, %c0_117, %c0_118] : memref<27x4x128xbf16, #tpu.memory_space<vmem>>, vector<1x4x128xbf16>
    %88 = vector.shape_cast %87 : vector<1x4x128xbf16> to vector<4x128xbf16>
    %cst_119 = arith.constant dense<0.000000e+00> : vector<24x128xf32>
    %89 = tpu.matmul %86, %88, %cst_119 {dimension_numbers = #tpu.dot_dimension_numbers<[1], [0], [0], [1], [0, 0, 1, 1], [], []>} : vector<24x4xbf16>, vector<4x128xbf16>, vector<24x128xf32> -> vector<24x128xf32>
    %90 = arith.addf %84, %89 : vector<24x128xf32>
    %c0_120 = arith.constant 0 : index
    %c0_121 = arith.constant 0 : index
    %c0_122 = arith.constant 0 : index
    %c5_123 = arith.constant 5 : index
    %c0_124 = arith.constant 0 : index
    %91 = vector.load %arg3[%c0_120, %c0_121, %c0_122, %c5_123, %c0_124] : memref<1x2x2x32x4xbf16, #tpu.memory_space<vmem>>, vector<1x1x1x24x4xbf16>
    %92 = vector.shape_cast %91 : vector<1x1x1x24x4xbf16> to vector<24x4xbf16>
    %c15 = arith.constant 15 : index
    %c0_125 = arith.constant 0 : index
    %c0_126 = arith.constant 0 : index
    %93 = vector.load %arg5[%c15, %c0_125, %c0_126] : memref<27x4x128xbf16, #tpu.memory_space<vmem>>, vector<1x4x128xbf16>
    %94 = vector.shape_cast %93 : vector<1x4x128xbf16> to vector<4x128xbf16>
    %cst_127 = arith.constant dense<0.000000e+00> : vector<24x128xf32>
    %95 = tpu.matmul %92, %94, %cst_127 {dimension_numbers = #tpu.dot_dimension_numbers<[1], [0], [0], [1], [0, 0, 1, 1], [], []>} : vector<24x4xbf16>, vector<4x128xbf16>, vector<24x128xf32> -> vector<24x128xf32>
    %96 = arith.addf %90, %95 : vector<24x128xf32>
    %c0_128 = arith.constant 0 : index
    %c0_129 = arith.constant 0 : index
    %c1_130 = arith.constant 1 : index
    %c5_131 = arith.constant 5 : index
    %c0_132 = arith.constant 0 : index
    %97 = vector.load %arg3[%c0_128, %c0_129, %c1_130, %c5_131, %c0_132] : memref<1x2x2x32x4xbf16, #tpu.memory_space<vmem>>, vector<1x1x1x24x4xbf16>
    %98 = vector.shape_cast %97 : vector<1x1x1x24x4xbf16> to vector<24x4xbf16>
    %c16 = arith.constant 16 : index
    %c0_133 = arith.constant 0 : index
    %c0_134 = arith.constant 0 : index
    %99 = vector.load %arg5[%c16, %c0_133, %c0_134] : memref<27x4x128xbf16, #tpu.memory_space<vmem>>, vector<1x4x128xbf16>
    %100 = vector.shape_cast %99 : vector<1x4x128xbf16> to vector<4x128xbf16>
    %cst_135 = arith.constant dense<0.000000e+00> : vector<24x128xf32>
    %101 = tpu.matmul %98, %100, %cst_135 {dimension_numbers = #tpu.dot_dimension_numbers<[1], [0], [0], [1], [0, 0, 1, 1], [], []>} : vector<24x4xbf16>, vector<4x128xbf16>, vector<24x128xf32> -> vector<24x128xf32>
    %102 = arith.addf %96, %101 : vector<24x128xf32>
    %c0_136 = arith.constant 0 : index
    %c0_137 = arith.constant 0 : index
    %c0_138 = arith.constant 0 : index
    %c6_139 = arith.constant 6 : index
    %c0_140 = arith.constant 0 : index
    %103 = vector.load %arg3[%c0_136, %c0_137, %c0_138, %c6_139, %c0_140] : memref<1x2x2x32x4xbf16, #tpu.memory_space<vmem>>, vector<1x1x1x24x4xbf16>
    %104 = vector.shape_cast %103 : vector<1x1x1x24x4xbf16> to vector<24x4xbf16>
    %c17 = arith.constant 17 : index
    %c0_141 = arith.constant 0 : index
    %c0_142 = arith.constant 0 : index
    %105 = vector.load %arg5[%c17, %c0_141, %c0_142] : memref<27x4x128xbf16, #tpu.memory_space<vmem>>, vector<1x4x128xbf16>
    %106 = vector.shape_cast %105 : vector<1x4x128xbf16> to vector<4x128xbf16>
    %cst_143 = arith.constant dense<0.000000e+00> : vector<24x128xf32>
    %107 = tpu.matmul %104, %106, %cst_143 {dimension_numbers = #tpu.dot_dimension_numbers<[1], [0], [0], [1], [0, 0, 1, 1], [], []>} : vector<24x4xbf16>, vector<4x128xbf16>, vector<24x128xf32> -> vector<24x128xf32>
    %108 = arith.addf %102, %107 : vector<24x128xf32>
    %c0_144 = arith.constant 0 : index
    %c0_145 = arith.constant 0 : index
    %c0_146 = arith.constant 0 : index
    %c0_147 = arith.constant 0 : index
    %c0_148 = arith.constant 0 : index
    %109 = vector.load %arg4[%c0_144, %c0_145, %c0_146, %c0_147, %c0_148] : memref<1x2x2x32x4xbf16, #tpu.memory_space<vmem>>, vector<1x1x1x24x4xbf16>
    %110 = vector.shape_cast %109 : vector<1x1x1x24x4xbf16> to vector<24x4xbf16>
    %c18 = arith.constant 18 : index
    %c0_149 = arith.constant 0 : index
    %c0_150 = arith.constant 0 : index
    %111 = vector.load %arg5[%c18, %c0_149, %c0_150] : memref<27x4x128xbf16, #tpu.memory_space<vmem>>, vector<1x4x128xbf16>
    %112 = vector.shape_cast %111 : vector<1x4x128xbf16> to vector<4x128xbf16>
    %cst_151 = arith.constant dense<0.000000e+00> : vector<24x128xf32>
    %113 = tpu.matmul %110, %112, %cst_151 {dimension_numbers = #tpu.dot_dimension_numbers<[1], [0], [0], [1], [0, 0, 1, 1], [], []>} : vector<24x4xbf16>, vector<4x128xbf16>, vector<24x128xf32> -> vector<24x128xf32>
    %114 = arith.addf %108, %113 : vector<24x128xf32>
    %c0_152 = arith.constant 0 : index
    %c0_153 = arith.constant 0 : index
    %c1_154 = arith.constant 1 : index
    %c0_155 = arith.constant 0 : index
    %c0_156 = arith.constant 0 : index
    %115 = vector.load %arg4[%c0_152, %c0_153, %c1_154, %c0_155, %c0_156] : memref<1x2x2x32x4xbf16, #tpu.memory_space<vmem>>, vector<1x1x1x24x4xbf16>
    %116 = vector.shape_cast %115 : vector<1x1x1x24x4xbf16> to vector<24x4xbf16>
    %c19 = arith.constant 19 : index
    %c0_157 = arith.constant 0 : index
    %c0_158 = arith.constant 0 : index
    %117 = vector.load %arg5[%c19, %c0_157, %c0_158] : memref<27x4x128xbf16, #tpu.memory_space<vmem>>, vector<1x4x128xbf16>
    %118 = vector.shape_cast %117 : vector<1x4x128xbf16> to vector<4x128xbf16>
    %cst_159 = arith.constant dense<0.000000e+00> : vector<24x128xf32>
    %119 = tpu.matmul %116, %118, %cst_159 {dimension_numbers = #tpu.dot_dimension_numbers<[1], [0], [0], [1], [0, 0, 1, 1], [], []>} : vector<24x4xbf16>, vector<4x128xbf16>, vector<24x128xf32> -> vector<24x128xf32>
    %120 = arith.addf %114, %119 : vector<24x128xf32>
    %c0_160 = arith.constant 0 : index
    %c0_161 = arith.constant 0 : index
    %c0_162 = arith.constant 0 : index
    %c1_163 = arith.constant 1 : index
    %c0_164 = arith.constant 0 : index
    %121 = vector.load %arg4[%c0_160, %c0_161, %c0_162, %c1_163, %c0_164] : memref<1x2x2x32x4xbf16, #tpu.memory_space<vmem>>, vector<1x1x1x24x4xbf16>
    %122 = vector.shape_cast %121 : vector<1x1x1x24x4xbf16> to vector<24x4xbf16>
    %c20 = arith.constant 20 : index
    %c0_165 = arith.constant 0 : index
    %c0_166 = arith.constant 0 : index
    %123 = vector.load %arg5[%c20, %c0_165, %c0_166] : memref<27x4x128xbf16, #tpu.memory_space<vmem>>, vector<1x4x128xbf16>
    %124 = vector.shape_cast %123 : vector<1x4x128xbf16> to vector<4x128xbf16>
    %cst_167 = arith.constant dense<0.000000e+00> : vector<24x128xf32>
    %125 = tpu.matmul %122, %124, %cst_167 {dimension_numbers = #tpu.dot_dimension_numbers<[1], [0], [0], [1], [0, 0, 1, 1], [], []>} : vector<24x4xbf16>, vector<4x128xbf16>, vector<24x128xf32> -> vector<24x128xf32>
    %126 = arith.addf %120, %125 : vector<24x128xf32>
    %c0_168 = arith.constant 0 : index
    %c1_169 = arith.constant 1 : index
    %c0_170 = arith.constant 0 : index
    %c0_171 = arith.constant 0 : index
    %c0_172 = arith.constant 0 : index
    %127 = vector.load %arg4[%c0_168, %c1_169, %c0_170, %c0_171, %c0_172] : memref<1x2x2x32x4xbf16, #tpu.memory_space<vmem>>, vector<1x1x1x24x4xbf16>
    %128 = vector.shape_cast %127 : vector<1x1x1x24x4xbf16> to vector<24x4xbf16>
    %c21 = arith.constant 21 : index
    %c0_173 = arith.constant 0 : index
    %c0_174 = arith.constant 0 : index
    %129 = vector.load %arg5[%c21, %c0_173, %c0_174] : memref<27x4x128xbf16, #tpu.memory_space<vmem>>, vector<1x4x128xbf16>
    %130 = vector.shape_cast %129 : vector<1x4x128xbf16> to vector<4x128xbf16>
    %cst_175 = arith.constant dense<0.000000e+00> : vector<24x128xf32>
    %131 = tpu.matmul %128, %130, %cst_175 {dimension_numbers = #tpu.dot_dimension_numbers<[1], [0], [0], [1], [0, 0, 1, 1], [], []>} : vector<24x4xbf16>, vector<4x128xbf16>, vector<24x128xf32> -> vector<24x128xf32>
    %132 = arith.addf %126, %131 : vector<24x128xf32>
    %c0_176 = arith.constant 0 : index
    %c1_177 = arith.constant 1 : index
    %c1_178 = arith.constant 1 : index
    %c0_179 = arith.constant 0 : index
    %c0_180 = arith.constant 0 : index
    %133 = vector.load %arg4[%c0_176, %c1_177, %c1_178, %c0_179, %c0_180] : memref<1x2x2x32x4xbf16, #tpu.memory_space<vmem>>, vector<1x1x1x24x4xbf16>
    %134 = vector.shape_cast %133 : vector<1x1x1x24x4xbf16> to vector<24x4xbf16>
    %c22 = arith.constant 22 : index
    %c0_181 = arith.constant 0 : index
    %c0_182 = arith.constant 0 : index
    %135 = vector.load %arg5[%c22, %c0_181, %c0_182] : memref<27x4x128xbf16, #tpu.memory_space<vmem>>, vector<1x4x128xbf16>
    %136 = vector.shape_cast %135 : vector<1x4x128xbf16> to vector<4x128xbf16>
    %cst_183 = arith.constant dense<0.000000e+00> : vector<24x128xf32>
    %137 = tpu.matmul %134, %136, %cst_183 {dimension_numbers = #tpu.dot_dimension_numbers<[1], [0], [0], [1], [0, 0, 1, 1], [], []>} : vector<24x4xbf16>, vector<4x128xbf16>, vector<24x128xf32> -> vector<24x128xf32>
    %138 = arith.addf %132, %137 : vector<24x128xf32>
    %c0_184 = arith.constant 0 : index
    %c1_185 = arith.constant 1 : index
    %c0_186 = arith.constant 0 : index
    %c1_187 = arith.constant 1 : index
    %c0_188 = arith.constant 0 : index
    %139 = vector.load %arg4[%c0_184, %c1_185, %c0_186, %c1_187, %c0_188] : memref<1x2x2x32x4xbf16, #tpu.memory_space<vmem>>, vector<1x1x1x24x4xbf16>
    %140 = vector.shape_cast %139 : vector<1x1x1x24x4xbf16> to vector<24x4xbf16>
    %c23 = arith.constant 23 : index
    %c0_189 = arith.constant 0 : index
    %c0_190 = arith.constant 0 : index
    %141 = vector.load %arg5[%c23, %c0_189, %c0_190] : memref<27x4x128xbf16, #tpu.memory_space<vmem>>, vector<1x4x128xbf16>
    %142 = vector.shape_cast %141 : vector<1x4x128xbf16> to vector<4x128xbf16>
    %cst_191 = arith.constant dense<0.000000e+00> : vector<24x128xf32>
    %143 = tpu.matmul %140, %142, %cst_191 {dimension_numbers = #tpu.dot_dimension_numbers<[1], [0], [0], [1], [0, 0, 1, 1], [], []>} : vector<24x4xbf16>, vector<4x128xbf16>, vector<24x128xf32> -> vector<24x128xf32>
    %144 = arith.addf %138, %143 : vector<24x128xf32>
    %c0_192 = arith.constant 0 : index
    %c0_193 = arith.constant 0 : index
    %c0_194 = arith.constant 0 : index
    %c5_195 = arith.constant 5 : index
    %c0_196 = arith.constant 0 : index
    %145 = vector.load %arg4[%c0_192, %c0_193, %c0_194, %c5_195, %c0_196] : memref<1x2x2x32x4xbf16, #tpu.memory_space<vmem>>, vector<1x1x1x24x4xbf16>
    %146 = vector.shape_cast %145 : vector<1x1x1x24x4xbf16> to vector<24x4xbf16>
    %c24 = arith.constant 24 : index
    %c0_197 = arith.constant 0 : index
    %c0_198 = arith.constant 0 : index
    %147 = vector.load %arg5[%c24, %c0_197, %c0_198] : memref<27x4x128xbf16, #tpu.memory_space<vmem>>, vector<1x4x128xbf16>
    %148 = vector.shape_cast %147 : vector<1x4x128xbf16> to vector<4x128xbf16>
    %cst_199 = arith.constant dense<0.000000e+00> : vector<24x128xf32>
    %149 = tpu.matmul %146, %148, %cst_199 {dimension_numbers = #tpu.dot_dimension_numbers<[1], [0], [0], [1], [0, 0, 1, 1], [], []>} : vector<24x4xbf16>, vector<4x128xbf16>, vector<24x128xf32> -> vector<24x128xf32>
    %150 = arith.addf %144, %149 : vector<24x128xf32>
    %c0_200 = arith.constant 0 : index
    %c0_201 = arith.constant 0 : index
    %c1_202 = arith.constant 1 : index
    %c5_203 = arith.constant 5 : index
    %c0_204 = arith.constant 0 : index
    %151 = vector.load %arg4[%c0_200, %c0_201, %c1_202, %c5_203, %c0_204] : memref<1x2x2x32x4xbf16, #tpu.memory_space<vmem>>, vector<1x1x1x24x4xbf16>
    %152 = vector.shape_cast %151 : vector<1x1x1x24x4xbf16> to vector<24x4xbf16>
    %c25 = arith.constant 25 : index
    %c0_205 = arith.constant 0 : index
    %c0_206 = arith.constant 0 : index
    %153 = vector.load %arg5[%c25, %c0_205, %c0_206] : memref<27x4x128xbf16, #tpu.memory_space<vmem>>, vector<1x4x128xbf16>
    %154 = vector.shape_cast %153 : vector<1x4x128xbf16> to vector<4x128xbf16>
    %cst_207 = arith.constant dense<0.000000e+00> : vector<24x128xf32>
    %155 = tpu.matmul %152, %154, %cst_207 {dimension_numbers = #tpu.dot_dimension_numbers<[1], [0], [0], [1], [0, 0, 1, 1], [], []>} : vector<24x4xbf16>, vector<4x128xbf16>, vector<24x128xf32> -> vector<24x128xf32>
    %156 = arith.addf %150, %155 : vector<24x128xf32>
    %c0_208 = arith.constant 0 : index
    %c0_209 = arith.constant 0 : index
    %c0_210 = arith.constant 0 : index
    %c6_211 = arith.constant 6 : index
    %c0_212 = arith.constant 0 : index
    %157 = vector.load %arg4[%c0_208, %c0_209, %c0_210, %c6_211, %c0_212] : memref<1x2x2x32x4xbf16, #tpu.memory_space<vmem>>, vector<1x1x1x24x4xbf16>
    %158 = vector.shape_cast %157 : vector<1x1x1x24x4xbf16> to vector<24x4xbf16>
    %c26 = arith.constant 26 : index
    %c0_213 = arith.constant 0 : index
    %c0_214 = arith.constant 0 : index
    %159 = vector.load %arg5[%c26, %c0_213, %c0_214] : memref<27x4x128xbf16, #tpu.memory_space<vmem>>, vector<1x4x128xbf16>
    %160 = vector.shape_cast %159 : vector<1x4x128xbf16> to vector<4x128xbf16>
    %cst_215 = arith.constant dense<0.000000e+00> : vector<24x128xf32>
    %161 = tpu.matmul %158, %160, %cst_215 {dimension_numbers = #tpu.dot_dimension_numbers<[1], [0], [0], [1], [0, 0, 1, 1], [], []>} : vector<24x4xbf16>, vector<4x128xbf16>, vector<24x128xf32> -> vector<24x128xf32>
    %162 = arith.addf %156, %161 : vector<24x128xf32>
    %c0_216 = arith.constant 0 : index
    %c0_217 = arith.constant 0 : index
    %163 = vector.load %arg6[%c0_216, %c0_217] : memref<1x128xf32, #tpu.memory_space<vmem>>, vector<1x128xf32>
    %164 = vector.broadcast %163 : vector<1x128xf32> to vector<24x128xf32>
    %165 = arith.addf %162, %164 : vector<24x128xf32>
    %c0_218 = arith.constant 0 : index
    %c0_219 = arith.constant 0 : index
    %c0_220 = arith.constant 0 : index
    %166 = vector.load %arg7[%c0_218, %c0_219, %c0_220] : memref<1x24x128xf32, #tpu.memory_space<vmem>>, vector<1x24x128xf32>
    %167 = vector.shape_cast %166 : vector<1x24x128xf32> to vector<24x128xf32>
    %168 = vector.shape_cast %165 : vector<24x128xf32> to vector<1x24x128xf32>
    tpu.vector_store %arg7[%c0_218, %c0_219, %c0_220], %168 {strides = array<i32>} : memref<1x24x128xf32, #tpu.memory_space<vmem>>, vector<1x24x128xf32>,
    return
  }
  func.func @transform_0(%arg0: i32, %arg1: i32) -> (i32, i32, i32, i32, i32) {
    %c10_i32 = arith.constant 10 : i32
    %0 = arith.muli %arg0, %c10_i32 : i32
    %c2_i32 = arith.constant 2 : i32
    %1 = arith.muli %c2_i32, %arg1 : i32
    %2 = arith.addi %0, %1 : i32
    %c0_i32 = arith.constant 0 : i32
    %3 = arith.addi %2, %c0_i32 : i32
    %c0_i32_0 = arith.constant 0 : i32
    %c0_i32_1 = arith.constant 0 : i32
    %c0_i32_2 = arith.constant 0 : i32
    %c0_i32_3 = arith.constant 0 : i32
    %c0_i32_4 = arith.constant 0 : i32
    return %3, %c0_i32_0, %c0_i32_1, %c0_i32_2, %c0_i32_3 : i32, i32, i32, i32, i32
  }
  func.func @transform_1(%arg0: i32, %arg1: i32) -> (i32, i32, i32, i32, i32) {
    %c10_i32 = arith.constant 10 : i32
    %0 = arith.muli %arg0, %c10_i32 : i32
    %c2_i32 = arith.constant 2 : i32
    %1 = arith.muli %c2_i32, %arg1 : i32
    %2 = arith.addi %0, %1 : i32
    %c1_i32 = arith.constant 1 : i32
    %3 = arith.addi %2, %c1_i32 : i32
    %c0_i32 = arith.constant 0 : i32
    %c0_i32_0 = arith.constant 0 : i32
    %c0_i32_1 = arith.constant 0 : i32
    %c0_i32_2 = arith.constant 0 : i32
    %c0_i32_3 = arith.constant 0 : i32
    return %3, %c0_i32, %c0_i32_0, %c0_i32_1, %c0_i32_2 : i32, i32, i32, i32, i32
  }
  func.func @transform_2(%arg0: i32, %arg1: i32) -> (i32, i32, i32, i32, i32) {
    %c10_i32 = arith.constant 10 : i32
    %0 = arith.muli %arg0, %c10_i32 : i32
    %c2_i32 = arith.constant 2 : i32
    %1 = arith.muli %c2_i32, %arg1 : i32
    %2 = arith.addi %0, %1 : i32
    %c2_i32_0 = arith.constant 2 : i32
    %3 = arith.addi %2, %c2_i32_0 : i32
    %c0_i32 = arith.constant 0 : i32
    %c0_i32_1 = arith.constant 0 : i32
    %c0_i32_2 = arith.constant 0 : i32
    %c0_i32_3 = arith.constant 0 : i32
    %c0_i32_4 = arith.constant 0 : i32
    return %3, %c0_i32, %c0_i32_1, %c0_i32_2, %c0_i32_3 : i32, i32, i32, i32, i32
  }
  func.func @transform_3(%arg0: i32, %arg1: i32) -> (i32, i32, i32) {
    %c0_i32 = arith.constant 0 : i32
    %c0_i32_0 = arith.constant 0 : i32
    %c0_i32_1 = arith.constant 0 : i32
    %c0_i32_2 = arith.constant 0 : i32
    return %c0_i32, %c0_i32_0, %c0_i32_1 : i32, i32, i32
  }
  func.func @transform_4(%arg0: i32, %arg1: i32) -> (i32, i32) {
    %c0_i32 = arith.constant 0 : i32
    %c0_i32_0 = arith.constant 0 : i32
    %c0_i32_1 = arith.constant 0 : i32
    return %c0_i32, %c0_i32_0 : i32, i32
  }
  func.func @transform_5(%arg0: i32, %arg1: i32) -> (i32, i32, i32) {
    %c4_i32 = arith.constant 4 : i32
    %0 = arith.muli %arg0, %c4_i32 : i32
    %1 = arith.addi %0, %arg1 : i32
    %c0_i32 = arith.constant 0 : i32
    %c0_i32_0 = arith.constant 0 : i32
    %c0_i32_1 = arith.constant 0 : i32
    return %1, %c0_i32, %c0_i32_0 : i32, i32, i32
  }
}

</mosaic_0001>

<bundles_post_ra>
// kernel: downsample3d.1
= control target key start
LH: loop header
LB: loop body
LE: loop exit
PB: predicated region body
PF: predicated region fallthrough
CT: control target
= control target key end

     0   :  { %s3295_s18 = smov 0   ;;  %s3297_s19 = smov 0   ;;  %s3683_s0 = inlined_call_operand.vmem [shape: bf16[20,2,2,32,4], index: 0, kind: input, shape index: {}, may-alias: {0,1,2}]   ;;  %s3684_s1 = inlined_call_operand.vmem [shape: bf16[20,2,2,32,4], index: 1, kind: input, shape index: {}, may-alias: {0,1,2}]   ;;  %s3685_s2 = inlined_call_operand.vmem [shape: bf16[20,2,2,32,4], index: 2, kind: input, shape index: {}, may-alias: {0,1,2}]   ;;  %s3686_s3 = inlined_call_operand.vmem [shape: bf16[27,4,128], index: 3, kind: input, shape index: {}]   ;;  %s3687_s4 = inlined_call_operand.vmem [shape: f32[1,128], index: 4, kind: input, shape index: {}]   ;;  %s3688_s5 = inlined_call_operand.vmem [shape: f32[8,24,128], index: 5, kind: output, shape index: {}]  }
   0x1   :  { %s3299_s20 = smov 0   ;;  %s3301_s21 = smov 0  }
   0x2   :  { %s3303_s22 = smov 0  }
   0x3 LB: > { %s24_s23 = sadd.s32 1, %s3255_s20  ;;  %s27_s24 = sadd.s32 1, %s3259_s21  ;;  %s3263_s22 = sphi %s3303_s22, %s15_s22   ;;  %s3259_s21 = sphi %s3301_s21, %s3692_s21   ;;  %s3255_s20 = sphi %s3299_s20, %s3691_s20   ;;  %s3251_s19 = sphi %s3297_s19, %s3690_s19   ;;  %s3247_s18 = sphi %s3295_s18, %s3689_s18  }
   0x4   : > { %p25_p0 = scmp.ge.s32.totalorder %s24_s23, 4  ;;  %p2663_p1 = scmp.ge.s32.totalorder %s3263_s22, 1 }
   0x5   : > { %p267_p2 = scmp.lt.s32.totalorder %s3263_s22, 9 }
   0x6   : > { %s3694_s23 = smov (%p25_p0, %s24_s23), 0  ;;  %s3696_s24 = smov (!%p25_p0, %s27_s24), %s3259_s21 }
   0x7   : > { %p268_p3 = pnand %p2663_p1, %p267_p2  ;;  %p29_p4 = scmp.ge.s32.totalorder %s3696_s24, 2 }
   0x8   : > { %v2678_v0 = vld [vmem:[%s3686_s3 + $0x2] sm:$0x3] (!%p268_p3)  ;;  %vm390_vm0 = vcmask (!%p268_p3), 1041408   ;;  %v368_v1 = vld [vmem:[%s3686_s3] sm:$0x3] (!%p268_p3)  ;;  %s318_s29 = smul.u32 (!%p268_p3), 10, %s3251_s19 }
   0x9   : > { %s3698_s24 = smov (%p29_p4, %s3696_s24), 0  ;;  %271 = sbr.rel (%p268_p3) target bundleno = 348 (0x15c), region = 40 }
   0xa   : > { %3106 = vmatprep.subr.msk.bf16.mxu0 (!%p268_p3), %vm390_vm0, %v2678_v0  ;;  %v392_v2 = vsel (!%p268_p3), %vm390_vm0, %v2678_v0, 0  ;;  %3107 = vmatprep.subr.msk.bf16.mxu1 (!%p268_p3), %vm390_vm0, %v368_v1  ;;  %v457_v3 = vsel (!%p268_p3), %vm390_vm0, %v368_v1, 0  ;;  %s2664_s30 = sshll.u32 (!%p268_p3), %s3247_s18, 1  ;;  %v2687_v4 = vld [vmem:[%s3686_s3 + $0x4] sm:$0x3] (!%p268_p3)  ;;  %vm383_vm1 = vcmask (!%p268_p3), 31744  }
   0xb   : > { %2945 = vmatpush3.bf16.msra.mxu0 (!%p268_p3), %v392_v2  ;;  %2951 = vmatpush3.bf16.msra.mxu1 (!%p268_p3), %v457_v3  ;;  %s3344_s8 = sadd.s32 (!%p268_p3), %s2664_s30, %s318_s29  ;;  %v2695_v5 = vld [vmem:[%s3686_s3 + $0x6] sm:$0x3] (!%p268_p3)  ;;  %v546_v6 = vsel (!%p268_p3), %vm390_vm0, %v2687_v4, 0  ;;  %vm523_vm2 = vsmask.f32 (!%p268_p3), 7424  ;;  %vm1025_vm4 = vcmask (!%p268_p3), 1044480  }
   0xc   : > { %p321_p5 = scmp.lt.s32.totalorder (!%p268_p3), %s3344_s8, 19  ;;  %3108 = vmatprep.subr.msk.bf16.mxu0 (!%p268_p3), %vm390_vm0, %v2687_v4  ;;  %3109 = vmatprep.subr.msk.bf16.mxu1 (!%p268_p3), %vm390_vm0, %v2695_v5  ;;  %s332_s13 = sadd.s32 (!%p268_p3), 1, %s3344_s8  ;;  %v620_v8 = vsel (!%p268_p3), %vm390_vm0, %v2695_v5, 0  ;;  %v2703_v10 = vld [vmem:[%s3686_s3 + $0x8] sm:$0x3] (!%p268_p3) }
   0xd   : > { %p333_p6 = scmp.lt.s32.totalorder (!%p268_p3), %s332_s13, 19  ;;  %v2712_v11 = vld [vmem:[%s3686_s3 + $0xa] sm:$0x3] (!%p268_p3)  ;;  %v694_v24 = vsel (!%p268_p3), %vm390_vm0, %v2703_v10, 0  ;;  %v2717_v32 = vld [vmem:[%s3686_s3 + $0xc] sm:$0x3] (!%p268_p3) }
   0xe   : > { %v785_v25 = vsel (!%p268_p3), %vm390_vm0, %v2712_v11, 0  ;;  %vm848_vm3 = vsmask.f32 (!%p268_p3), 5376  ;;  %v2726_v36 = vld [vmem:[%s3686_s3 + $0xe] sm:$0x3] (!%p268_p3)  ;;  %v873_v50 = vsel (!%p268_p3), %vm390_vm0, %v2717_v32, 0 }
   0xf   : > { %v966_v55 = vsel (!%p268_p3), %vm390_vm0, %v2726_v36, 0  ;;  %s345_s27 = sadd.s32 (!%p268_p3), 2, %s3344_s8 }
  0x10   : > { %s322_s11 = scalar_select %p321_p5, %s3344_s8, 19 }
  0x11   : > { %s3700_s13 = smov (!%p333_p6, %s332_s13), 19  ;;  %p346_p7 = scmp.lt.s32.totalorder %s345_s27, 19 }
  0x12   : > { %s2860_s12 = sshll.u32 %s322_s11, 6  ;;  %s2861_s28 = sshll.u32 %s3700_s13, 6 }
  0x13   : > { %s3357_s16 = scalar_lea.vmem %s3683_s0, %s2860_s12  ;;  %s3422_s11 = scalar_lea.vmem %s3684_s1, %s2861_s28 }
  0x14   : > { %v3174_v7 = vld [vmem:[%s3357_s16 + $0x10] sm:$0xff]   ;;  %v3175_v9 = vld [vmem:[%s3357_s16] sm:$0xff]   ;;  %v3176_v12 = vld [vmem:[%s3357_s16 + $0x18] ss:$0 sps:$4 sm:$0xff]   ;;  %s3702_s27 = smov (!%p346_p7, %s345_s27), 19 }
  0x15   : > { %2946 = vmatprep.mubr.msk.bf16.mxu0 %vm383_vm1, %v3174_v7  ;;  %2952 = vmatprep.mubr.msk.bf16.mxu1 %vm383_vm1, %v3175_v9  ;;  %v3177_v13 = vld [vmem:[%s3357_s16 + $0x8] ss:$0 sps:$4 sm:$0xff]   ;;  %v507_v14 = vld [vmem:[%s3357_s16] sm:$0xf]  ;;  %v3377_v15 = vld [vmem:[%s3357_s16 + $0x4] sm:$0xf] }
  0x16   : > { %2947 = vmatmul.mubr.msk.bf16.vlgmr.msra.gmra.mrb[0].mxu0 %vm383_vm1, %v3176_v12  ;;  %v509_v16 = vld [vmem:[%s3357_s16 + $0x8] sm:$0xf]  ;;  %v510_v17 = vld [vmem:[%s3357_s16 + $0xc] sm:$0x1]  ;;  %v2688_v18 = vcombine.low %v507_v14, %v3377_v15  ;;  %2953 = vmatmul.mubr.msk.bf16.vlgmr.msra.gmra.mrb[0].mxu1 %vm383_vm1, %v3177_v13  ;;  %v3181_v21 = vld [vmem:[%s3357_s16 + $0x20] sm:$0xff]   ;;  %s2862_s6 = sshll.u32 %s3702_s27, 6 }
  0x17   : > { %v839_v19 = vld [vmem:[%s3357_s16 + $0xc] sm:$0x7]  ;;  %2957 = vmatpush3.bf16.msra.mxu0 %v546_v6  ;;  %v2689_v20 = vcombine.low %v509_v16, %v510_v17  ;;  %2963 = vmatpush3.bf16.msra.mxu1 %v620_v8  ;;  %v3182_v30 = vld [vmem:[%s3357_s16 + $0x28] ss:$0 sps:$4 sm:$0xff]   ;;  %v3185_v33 = vld [vmem:[%s3357_s16 + $0x20] sm:$0xff]   ;;  %s3505_s10 = scalar_lea.vmem %s3685_s2, %s2862_s6 }
  0x18   : > { %v525_v22 = vshrl.u32 %v2688_v18, 16  ;;  %v527_v23 = vshll.u32 %v2688_v18, 16  ;;  %3110 = vmatprep.subr.msk.bf16.mxu0 %vm390_vm0, %v2703_v10  ;;  %v3389_v28 = vcombine.low %v509_v16, %v839_v19  ;;  %2964 = vmatprep.mubr.msk.bf16.mxu1 %vm383_vm1, %v3181_v21  ;;  %v3186_v35 = vld [vmem:[%s3357_s16 + $0x28] sm:$0x1f]   ;;  %v3183_v38 = vld [vmem:[%s3357_s16 + $0x30] sm:$0xff]   ;;  %v764_v39 = vshrl.u32 %v3185_v33, 16 }
  0x19   : > { %v532_v26 = vshll.u32 %v2689_v20, 16  ;;  %v536_v27 = vshrl.u32 %v2689_v20, 16  ;;  %3111 = vmatprep.subr.msk.bf16.mxu1 %vm390_vm0, %v2712_v11  ;;  %v766_v40 = vshll.u32 %v3185_v33, 16  ;;  %v838_v41 = vld [vmem:[%s3357_s16] sm:$0xc]  ;;  %v771_v44 = vshll.u32 %v3186_v35, 16 }
  0x1a   : > { %v529_v29 = vrot.slane %v527_v23, 1  ;;  %v858_v42 = vshrl.u32 %v3389_v28, 16  ;;  %v775_v45 = vshrl.u32 %v3186_v35, 16  ;;  %v2718_v46 = vcombine.low %v838_v41, %v3377_v15  ;;  %v3188_v57 = vld [vmem:[%s3357_s16 + $0x10] sm:$0xfc]  }
  0x1b   : > { %v534_v31 = vrot.slane %v532_v26, 1  ;;  %v768_v47 = vrot.slane %v766_v40, 1  ;;  %v861_v49 = vshll.u32 %v3389_v28, 16  ;;  %v773_v51 = vrot.slane %v771_v44, 1  ;;  %v3189_v58 = vld [vmem:[%s3357_s16 + $0x18] sm:$0x7f]  }
  0x1c   : > { %v530_v34 = vor.u32 %v529_v29, %v525_v22  ;;  %v860_v48 = vrot.slane %v858_v42, 2  ;;  %v850_v52 = vshrl.u32 %v2718_v46, 16  ;;  %v853_v53 = vshll.u32 %v2718_v46, 16  ;;  %v1019_v62 = vld [vmem:[%s3357_s16] sm:$0x8] }
  0x1d   : > { %v538_v37 = vor.u32 %v536_v27, %v534_v31  ;;  %v769_v54 = vor.u32 %v768_v47, %v764_v39  ;;  %v863_v56 = vrot.slane %v861_v49, 3  ;;  %v777_v59 = vor.u32 %v775_v45, %v773_v51  ;;  %v3184_v3 = vld [vmem:[%s3357_s16 + $0x38] ss:$0 sps:$4 sm:$0xff]   ;;  %v2731_v10 = vld [vmem:[%s3686_s3 + $0x10] sm:$0x3]  ;;  %v3202_v40 = vld [vmem:[%s3422_s11 + $0x20] sm:$0xff]  }
  0x1e   : > { %v535_v43 = vsel %vm523_vm2, %v530_v34, %v534_v31  ;;  %2965 = vmatmul.mubr.msk.bf16.vlgmr.msra.gmra.mrb[4].mxu1 %vm383_vm1, %v3182_v30  ;;  %v852_v60 = vrot.slane %v850_v52, 2  ;;  %v855_v61 = vrot.slane %v853_v53, 3  ;;  %v943_v1 = vshrl.u32 %v3188_v57, 16  ;;  %v2735_v16 = vld [vmem:[%s3686_s3 + $0x12] sm:$0x3] }
  0x1f   : > { %2958 = vmatprep.mubr.msk.bf16.mxu0 %vm383_vm1, %v535_v43  ;;  %2975 = vmatpush3.bf16.msra.mxu1 %v785_v25  ;;  %v774_v63 = vsel %vm523_vm2, %v769_v54, %v773_v51  ;;  %v864_v0 = vor.u32 %v863_v56, %v860_v48  ;;  %v946_v2 = vshll.u32 %v3188_v57, 16  ;;  %v951_v5 = vshrl.u32 %v3189_v58, 16  ;;  %v1236_v17 = vld [vmem:[%s3422_s11] sm:$0xf]  ;;  %v3441_v18 = vld [vmem:[%s3422_s11 + $0x4] sm:$0xf] }
  0x20   : > { %2959 = vmatmul.mubr.msk.bf16.vlgmr.msra.gmra.mrb[4].mxu0 %vm383_vm1, %v538_v37  ;;  %3113 = vmatprep.subr.msk.bf16.mxu1 %vm390_vm0, %v2726_v36  ;;  %v856_v4 = vor.u32 %v855_v61, %v852_v60  ;;  %v954_v6 = vshll.u32 %v3189_v58, 16  ;;  %v945_v7 = vrot.slane %v943_v1, 2  ;;  %v2732_v13 = vcombine.low %v1019_v62, %v3377_v15  ;;  %v1238_v20 = vld [vmem:[%s3422_s11 + $0x8] sm:$0xf]  ;;  %v1239_v21 = vld [vmem:[%s3422_s11 + $0xc] sm:$0x1] }
  0x21   : > { %2969 = vmatpush3.bf16.msra.mxu0 %v694_v24  ;;  %2970 = vmatprep.mubr.msk.bf16.mxu0 %vm383_vm1, %v3183_v38  ;;  %v948_v8 = vrot.slane %v946_v2, 3  ;;  %v953_v11 = vrot.slane %v951_v5, 2  ;;  %v2749_v22 = vcombine.low %v1236_v17, %v3441_v18  ;;  %v1027_v24 = vrot.slane %v3389_v28, 3  ;;  %v2743_v30 = vld [vmem:[%s3686_s3 + $0x14] sm:$0x3] }
  0x22   : > { %3112 = vmatprep.subr.msk.bf16.mxu0 %vm390_vm0, %v2717_v32  ;;  %2976 = vmatprep.mubr.msk.bf16.mxu1 %vm383_vm1, %v774_v63  ;;  %v865_v9 = vsel %vm848_vm3, %v856_v4, %v864_v0  ;;  %v956_v12 = vrot.slane %v954_v6, 3  ;;  %v1026_v23 = vrot.slane %v2732_v13, 3  ;;  %v2750_v25 = vcombine.low %v1238_v20, %v1239_v21  ;;  %v3191_v32 = vld [vmem:[%s3422_s11] sm:$0xff]   ;;  %v2748_v35 = vld [vmem:[%s3686_s3 + $0x16] sm:$0x3] }
  0x23   : > { %v949_v14 = vor.u32 %v948_v8, %v945_v7  ;;  %v1255_v26 = vshll.u32 %v2749_v22, 16  ;;  %v1036_v27 = vsel %vm390_vm0, %v2731_v10, 0  ;;  %v1109_v29 = vsel %vm390_vm0, %v2735_v16, 0  ;;  %v3192_v36 = vld [vmem:[%s3422_s11 + $0x8] ss:$0 sps:$4 sm:$0xff]   ;;  %v3193_v43 = vld [vmem:[%s3422_s11 + $0x10] sm:$0xff]  }
  0x24   : > { %v957_v19 = vor.u32 %v956_v12, %v953_v11  ;;  %v1028_v31 = vsel %vm1025_vm4, %v1026_v23, %v1027_v24  ;;  %v1253_v33 = vshrl.u32 %v2749_v22, 16  ;;  %v1260_v34 = vshll.u32 %v2750_v25, 16  ;;  %v1567_v37 = vld [vmem:[%s3422_s11 + $0xc] sm:$0x7]  ;;  %v1566_v41 = vld [vmem:[%s3422_s11] sm:$0xc] }
  0x25   : > { %v1257_v28 = vrot.slane %v1255_v26, 1  ;;  %v1274_v42 = vsel %vm390_vm0, %v2748_v35, 0  ;;  %v1183_v44 = vsel %vm390_vm0, %v2743_v30, 0  ;;  %v3477_v45 = vcombine.low %v1238_v20, %v1567_v37  ;;  %v2756_v46 = vld [vmem:[%s3686_s3 + $0x18] sm:$0x3]  ;;  %v3200_v63 = vld [vmem:[%s3422_s11 + $0x30] sm:$0xff]  }
  0x26   : > { %2977 = vmatmul.mubr.msk.bf16.vlgmr.msra.gmra.mrb[8].mxu1 %vm383_vm1, %v777_v59  ;;  %v958_v15 = vsel %vm848_vm3, %v949_v14, %v957_v19  ;;  %v1262_v39 = vrot.slane %v1260_v34, 1  ;;  %v1264_v48 = vshrl.u32 %v2750_v25, 16  ;;  %v2764_v49 = vld [vmem:[%s3686_s3 + $0x1a] sm:$0x3]  ;;  %v3490_v51 = vld [vmem:[%s3422_s11 + $0x28] sm:$0x1f]  }
  0x27   : > { %2987 = vmatpush3.bf16.msra.mxu1 %v966_v55  ;;  %2988 = vmatprep.mubr.msk.bf16.mxu1 %vm383_vm1, %v958_v15  ;;  %v1258_v38 = vor.u32 %v1257_v28, %v1253_v33  ;;  %v1494_v52 = vshll.u32 %v3202_v40, 16  ;;  %v1348_v53 = vsel %vm390_vm0, %v2756_v46, 0  ;;  %v1422_v54 = vsel %vm390_vm0, %v2764_v49, 0  ;;  %v3194_v57 = vld [vmem:[%s3422_s11 + $0x18] ss:$0 sps:$4 sm:$0xff]   ;;  %v3198_v59 = vld [vmem:[%s3422_s11 + $0x20] sm:$0xff]  }
  0x28   : > { %2971 = vmatmul.mubr.msk.bf16.vlgmr.msra.gmra.mrb[8].mxu0 %vm383_vm1, %v3184_v3  ;;  %3115 = vmatprep.subr.msk.bf16.mxu1 %vm390_vm0, %v2735_v16  ;;  %v1492_v55 = vshrl.u32 %v3202_v40, 16  ;;  %v1585_v56 = vshrl.u32 %v3477_v45, 16  ;;  %v1266_v58 = vor.u32 %v1264_v48, %v1262_v39  ;;  %v1588_v62 = vshll.u32 %v3477_v45, 16  ;;  %v3205_v2 = vld [vmem:[%s3422_s11 + $0x10] sm:$0xfc]  }
  0x29   : > { %2981 = vmatpush3.bf16.msra.mxu0 %v873_v50  ;;  %2982 = vmatprep.mubr.msk.bf16.mxu0 %vm383_vm1, %v865_v9  ;;  %v1263_v47 = vsel %vm523_vm2, %v1258_v38, %v1262_v39  ;;  %v2779_v50 = vcombine.low %v1566_v41, %v3441_v18  ;;  %v1499_v1 = vshll.u32 %v3490_v51, 16  ;;  %v3206_v3 = vld [vmem:[%s3422_s11 + $0x18] sm:$0x7f]   ;;  %v1670_v11 = vshrl.u32 %v3205_v2, 16  ;;  %v1746_v21 = vld [vmem:[%s3422_s11] sm:$0x8] }
  0x2a   : > { %3114 = vmatprep.subr.msk.bf16.mxu0 %vm390_vm0, %v2731_v10  ;;  %v2773_v4 = vld [vmem:[%s3686_s3 + $0x1c] sm:$0x3]  ;;  %v1587_v7 = vrot.slane %v1585_v56, 2  ;;  %v1590_v8 = vrot.slane %v1588_v62, 3  ;;  %v2778_v9 = vld [vmem:[%s3686_s3 + $0x1e] sm:$0x3] }
  0x2b   : > { %v1577_v60 = vshrl.u32 %v2779_v50, 16  ;;  %v1580_v61 = vshll.u32 %v2779_v50, 16  ;;  %v3201_v10 = vld [vmem:[%s3422_s11 + $0x38] ss:$0 sps:$4 sm:$0xff]   ;;  %v1673_v12 = vshll.u32 %v3205_v2, 16  ;;  %v1501_v14 = vrot.slane %v1499_v1, 1 }
  0x2c   : > { %v1678_v16 = vshrl.u32 %v3206_v3, 16  ;;  %v1681_v17 = vshll.u32 %v3206_v3, 16  ;;  %v1591_v20 = vor.u32 %v1590_v8, %v1587_v7  ;;  %v3199_v22 = vld [vmem:[%s3422_s11 + $0x28] ss:$0 sps:$4 sm:$0xff]   ;;  %v1513_v15 = vsel %vm390_vm0, %v2773_v4, 0 }
  0x2d   : > { %v1579_v5 = vrot.slane %v1577_v60, 2  ;;  %v1582_v6 = vrot.slane %v1580_v61, 3  ;;  %v1600_v23 = vsel %vm390_vm0, %v2778_v9, 0  ;;  %v1675_v25 = vrot.slane %v1673_v12, 3  ;;  %v2792_v28 = vld [vmem:[%s3686_s3 + $0x22] sm:$0x3] }
  0x2e   : > { %2989 = vmatmul.mubr.msk.bf16.vlgmr.msra.gmra.mrb[12].mxu1 %vm383_vm1, %v957_v19  ;;  %v1503_v33 = vshrl.u32 %v3490_v51, 16  ;;  %v1962_v37 = vld [vmem:[%s3505_s10] sm:$0xf]  ;;  %v3547_v38 = vld [vmem:[%s3505_s10 + $0x4] sm:$0xf]  ;;  %v1762_v40 = vsel %vm390_vm0, %v2792_v28, 0 }
  0x2f   : > { %2999 = vmatpush3.bf16.msra.mxu1 %v1109_v29  ;;  %3000 = vmatprep.mubr.msk.bf16.mxu1 %vm383_vm1, %v3191_v32  ;;  %v1583_v19 = vor.u32 %v1582_v6, %v1579_v5  ;;  %v1683_v29 = vrot.slane %v1681_v17, 3  ;;  %v2804_v48 = vld [vmem:[%s3686_s3 + $0x26] sm:$0x3]  ;;  %v2817_v60 = vld [vmem:[%s3686_s3 + $0x2a] sm:$0x3] }
  0x30   : > { %2983 = vmatmul.mubr.msk.bf16.vlgmr.msra.gmra.mrb[12].mxu0 %vm383_vm1, %v864_v0  ;;  %3117 = vmatprep.subr.msk.bf16.mxu1 %vm390_vm0, %v2748_v35  ;;  %v1496_v0 = vrot.slane %v1494_v52, 1  ;;  %v1505_v39 = vor.u32 %v1503_v33, %v1501_v14  ;;  %v1909_v51 = vsel %vm390_vm0, %v2804_v48, 0  ;;  %v3208_v52 = vld [vmem:[%s3505_s10] sm:$0xff]   ;;  %v3211_v2 = vld [vmem:[%s3505_s10 + $0x18] ss:$0 sps:$4 sm:$0xff]   ;;  %v2074_v6 = vsel %vm390_vm0, %v2817_v60, 0 }
  0x31   : > { %2993 = vmatpush3.bf16.msra.mxu0 %v1036_v27  ;;  %2994 = vmatprep.mubr.msk.bf16.mxu0 %vm383_vm1, %v1028_v31  ;;  %v1680_v27 = vrot.slane %v1678_v16, 2  ;;  %v2787_v31 = vld [vmem:[%s3686_s3 + $0x20] sm:$0x3]  ;;  %v1592_v32 = vsel %vm848_vm3, %v1583_v19, %v1591_v20  ;;  %v2292_v3 = vld [vmem:[%s3505_s10] sm:$0xc] }
  0x32   : > { %3116 = vmatprep.subr.msk.bf16.mxu0 %vm390_vm0, %v2743_v30  ;;  %v1497_v13 = vor.u32 %v1496_v0, %v1492_v55  ;;  %v2793_v30 = vcombine.low %v1746_v21, %v3441_v18  ;;  %v1693_v41 = vsel %vm390_vm0, %v2787_v31, 0  ;;  %v3589_v0 = vld [vmem:[%s3505_s10 + $0x28] sm:$0x1f]   ;;  %v3222_v16 = vld [vmem:[%s3505_s10 + $0x10] sm:$0xfc]  }
  0x33   : > { %v1684_v34 = vor.u32 %v1683_v29, %v1680_v27  ;;  %v2225_v12 = vshll.u32 %v3589_v0, 16  ;;  %v3223_v17 = vld [vmem:[%s3505_s10 + $0x18] sm:$0x7f]   ;;  %v2396_v27 = vshrl.u32 %v3222_v16, 16  ;;  %v2399_v29 = vshll.u32 %v3222_v16, 16 }
  0x34   : > { %v1502_v26 = vsel %vm523_vm2, %v1497_v13, %v1501_v14  ;;  %v1752_v35 = vrot.slane %v2793_v30, 3  ;;  %v2840_v13 = vcombine.low %v2292_v3, %v3547_v38  ;;  %v2825_v14 = vld [vmem:[%s3686_s3 + $0x2c] sm:$0x3]  ;;  %v2404_v30 = vshrl.u32 %v3223_v17, 16 }
  0x35   : > { %v2148_v33 = vsel %vm390_vm0, %v2825_v14, 0 }
  0x36   : > { %3001 = vmatmul.mubr.msk.bf16.vlgmr.msra.gmra.mrb[16].mxu1 %vm383_vm1, %v3192_v36  ;;  %v1753_v36 = vrot.slane %v3477_v45, 3 }
  0x37   : > { %3011 = vmatpush3.bf16.msra.mxu1 %v1274_v42  ;;  %3012 = vmatprep.mubr.msk.bf16.mxu1 %vm383_vm1, %v1263_v47  ;;  %v1965_v47 = vld [vmem:[%s3505_s10 + $0xc] sm:$0x1] }
  0x38   : > { %2995 = vmatmul.mubr.msk.bf16.vlgmr.msra.gmra.mrb[16].mxu0 %vm383_vm1, %v1027_v24  ;;  %3119 = vmatprep.subr.msk.bf16.mxu1 %vm390_vm0, %v2764_v49  ;;  %v1672_v24 = vrot.slane %v1670_v11, 2  ;;  %v1754_v45 = vsel %vm1025_vm4, %v1752_v35, %v1753_v36 }
  0x39   : > { %3005 = vmatpush3.bf16.msra.mxu0 %v1183_v44  ;;  %3006 = vmatprep.mubr.msk.bf16.mxu0 %vm383_vm1, %v3193_v43  ;;  %v2810_v43 = vcombine.low %v1962_v37, %v3547_v38  ;;  %v2796_v44 = vld [vmem:[%s3686_s3 + $0x24] sm:$0x3] }
  0x3a   : > { %3118 = vmatprep.subr.msk.bf16.mxu0 %vm390_vm0, %v2756_v46  ;;  %v1676_v18 = vor.u32 %v1675_v25, %v1672_v24  ;;  %v1964_v46 = vld [vmem:[%s3505_s10 + $0x8] sm:$0xf]  ;;  %v2303_v24 = vshrl.u32 %v2840_v13, 16  ;;  %v2306_v25 = vshll.u32 %v2840_v13, 16 }
  0x3b   : > { %v3567_v49 = vcombine.low %v1964_v46, %v1965_v47  ;;  %v1981_v50 = vshll.u32 %v2810_v43, 16  ;;  %v1979_v55 = vshrl.u32 %v2810_v43, 16  ;;  %v2401_v43 = vrot.slane %v2399_v29, 3 }
  0x3c   : > { %v1685_v42 = vsel %vm848_vm3, %v1676_v18, %v1684_v34  ;;  %v3217_v18 = vld [vmem:[%s3505_s10 + $0x30] sm:$0xff]   ;;  %v2305_v37 = vrot.slane %v2303_v24, 2 }
  0x3d   : > { %v1983_v56 = vrot.slane %v1981_v50, 1  ;;  %v1990_v19 = vshrl.u32 %v3567_v49, 16 }
  0x3e   : > { %3013 = vmatmul.mubr.msk.bf16.vlgmr.msra.gmra.mrb[20].mxu1 %vm383_vm1, %v1266_v58  ;;  %v3219_v58 = vld [vmem:[%s3505_s10 + $0x20] sm:$0xff]  }
  0x3f   : > { %3023 = vmatpush3.bf16.msra.mxu1 %v1422_v54  ;;  %3024 = vmatprep.mubr.msk.bf16.mxu1 %vm383_vm1, %v3200_v63  ;;  %v3210_v54 = vld [vmem:[%s3505_s10 + $0x10] sm:$0xff]   ;;  %v1984_v61 = vor.u32 %v1983_v56, %v1979_v55  ;;  %v2293_v63 = vld [vmem:[%s3505_s10 + $0xc] sm:$0x7]  ;;  %v2220_v1 = vshll.u32 %v3219_v58, 16  ;;  %v2218_v8 = vshrl.u32 %v3219_v58, 16 }
  0x40   : > { %3007 = vmatmul.mubr.msk.bf16.vlgmr.msra.gmra.mrb[20].mxu0 %vm383_vm1, %v3194_v57  ;;  %3121 = vmatprep.subr.msk.bf16.mxu1 %vm390_vm0, %v2778_v9  ;;  %v1986_v57 = vshll.u32 %v3567_v49, 16  ;;  %v3597_v7 = vcombine.low %v1964_v46, %v2293_v63  ;;  %v2848_v46 = vld [vmem:[%s3686_s3 + $0x32] sm:$0x3]  ;;  %v2853_v58 = vld [vmem:[%s3686_s3 + $0x34] sm:$0x3] }
  0x41   : > { %3017 = vmatpush3.bf16.msra.mxu0 %v1348_v53  ;;  %3018 = vmatprep.mubr.msk.bf16.mxu0 %vm383_vm1, %v3198_v59  ;;  %v1835_v53 = vsel %vm390_vm0, %v2796_v44, 0  ;;  %v2809_v59 = vld [vmem:[%s3686_s3 + $0x28] sm:$0x3]  ;;  %v2222_v11 = vrot.slane %v2220_v1, 1 }
  0x42   : > { %3120 = vmatprep.subr.msk.bf16.mxu0 %vm390_vm0, %v2773_v4  ;;  %v1988_v62 = vrot.slane %v1986_v57, 1  ;;  %v3209_v4 = vld [vmem:[%s3505_s10 + $0x8] ss:$0 sps:$4 sm:$0xff]   ;;  %v2000_v5 = vsel %vm390_vm0, %v2809_v59, 0  ;;  %v2311_v21 = vshrl.u32 %v3597_v7, 16 }
  0x44   : > { %v1989_v9 = vsel %vm523_vm2, %v1984_v61, %v1988_v62  ;;  %v2313_v35 = vrot.slane %v2311_v21, 2  ;;  %v2488_v61 = vsel %vm390_vm0, %v2853_v58, 0 }
  0x46   : > { %3025 = vmatmul.mubr.msk.bf16.vlgmr.msra.gmra.mrb[24].mxu1 %vm383_vm1, %v3201_v10  ;;  %v3215_v10 = vld [vmem:[%s3505_s10 + $0x20] sm:$0xff]  }
  0x47   : > { %3035 = vmatpush3.bf16.msra.mxu1 %v1600_v23  ;;  %3036 = vmatprep.mubr.msk.bf16.mxu1 %vm383_vm1, %v1592_v32  ;;  %v2227_v23 = vrot.slane %v2225_v12, 1  ;;  %v1992_v32 = vor.u32 %v1990_v19, %v1988_v62 }
  0x48   : > { %3019 = vmatmul.mubr.msk.bf16.vlgmr.msra.gmra.mrb[24].mxu0 %vm383_vm1, %v3199_v22  ;;  %3123 = vmatprep.subr.msk.bf16.mxu1 %vm390_vm0, %v2792_v28  ;;  %v2314_v22 = vshll.u32 %v3597_v7, 16 }
  0x49   : > { %3029 = vmatpush3.bf16.msra.mxu0 %v1513_v15  ;;  %3030 = vmatprep.mubr.msk.bf16.mxu0 %vm383_vm1, %v1502_v26  ;;  %v2223_v15 = vor.u32 %v2222_v11, %v2218_v8  ;;  %v3216_v26 = vld [vmem:[%s3505_s10 + $0x28] ss:$0 sps:$4 sm:$0xff]  }
  0x4a   : > { %3122 = vmatprep.subr.msk.bf16.mxu0 %vm390_vm0, %v2787_v31  ;;  %v2407_v31 = vshll.u32 %v3223_v17, 16 }
  0x4e   : > { %3037 = vmatmul.mubr.msk.bf16.vlgmr.msra.gmra.mrb[28].mxu1 %vm383_vm1, %v1591_v20  ;;  %v2834_v20 = vld [vmem:[%s3686_s3 + $0x2e] sm:$0x3] }
  0x4f   : > { %3047 = vmatpush3.bf16.msra.mxu1 %v1762_v40  ;;  %3048 = vmatprep.mubr.msk.bf16.mxu1 %vm383_vm1, %v1754_v45  ;;  %v2239_v28 = vsel %vm390_vm0, %v2834_v20, 0  ;;  %v2316_v40 = vrot.slane %v2314_v22, 3  ;;  %v2409_v45 = vrot.slane %v2407_v31, 3 }
  0x50   : > { %3031 = vmatmul.mubr.msk.bf16.vlgmr.msra.gmra.mrb[28].mxu0 %vm383_vm1, %v1505_v39  ;;  %3125 = vmatprep.subr.msk.bf16.mxu1 %vm390_vm0, %v2804_v48  ;;  %v2308_v39 = vrot.slane %v2306_v25, 3 }
  0x51   : > { %3041 = vmatpush3.bf16.msra.mxu0 %v1693_v41  ;;  %3042 = vmatprep.mubr.msk.bf16.mxu0 %vm383_vm1, %v1685_v42  ;;  %v2839_v41 = vld [vmem:[%s3686_s3 + $0x30] sm:$0x3]  ;;  %v2398_v42 = vrot.slane %v2396_v27, 2  ;;  %v2317_v48 = vor.u32 %v2316_v40, %v2313_v35 }
  0x52   : > { %3124 = vmatprep.subr.msk.bf16.mxu0 %vm390_vm0, %v2796_v44  ;;  %v2406_v44 = vrot.slane %v2404_v30, 2  ;;  %v2309_v47 = vor.u32 %v2308_v39, %v2305_v37  ;;  %v2326_v55 = vsel %vm390_vm0, %v2839_v41, 0 }
  0x53   : > { %v2402_v50 = vor.u32 %v2401_v43, %v2398_v42 }
  0x54   : > { %v2318_v56 = vsel %vm848_vm3, %v2309_v47, %v2317_v48 }
  0x56   : > { %3049 = vmatmul.mubr.msk.bf16.vlgmr.msra.gmra.mrb[32].mxu1 %vm383_vm1, %v1753_v36  ;;  %v2228_v36 = vsel %vm523_vm2, %v2223_v15, %v2227_v23 }
  0x57   : > { %3059 = vmatpush3.bf16.msra.mxu1 %v1909_v51  ;;  %3060 = vmatprep.mubr.msk.bf16.mxu1 %vm383_vm1, %v3210_v54  ;;  %v2410_v51 = vor.u32 %v2409_v45, %v2406_v44  ;;  %v2419_v54 = vsel %vm390_vm0, %v2848_v46, 0 }
  0x58   : > { %3043 = vmatmul.mubr.msk.bf16.vlgmr.msra.gmra.mrb[32].mxu0 %vm383_vm1, %v1684_v34  ;;  %3127 = vmatprep.subr.msk.bf16.mxu1 %vm390_vm0, %v2817_v60  ;;  %v2229_v34 = vshrl.u32 %v3589_v0, 16 }
  0x59   : > { %3053 = vmatpush3.bf16.msra.mxu0 %v1835_v53  ;;  %3054 = vmatprep.mubr.msk.bf16.mxu0 %vm383_vm1, %v3208_v52  ;;  %v2472_v52 = vld [vmem:[%s3505_s10] sm:$0x8]  ;;  %v3218_v53 = vld [vmem:[%s3505_s10 + $0x38] ss:$0 sps:$4 sm:$0xff]   ;;  %s2673_s10 = sshll.u32 %s3251_s19, 2 }
  0x5a   : > { %3126 = vmatprep.subr.msk.bf16.mxu0 %vm390_vm0, %v2809_v59  ;;  %v2231_v49 = vor.u32 %v2229_v34, %v2227_v23  ;;  %v2854_v57 = vcombine.low %v2472_v52, %v3547_v38  ;;  %v2411_v59 = vsel %vm848_vm3, %v2402_v50, %v2410_v51  ;;  %v2479_v38 = vrot.slane %v3597_v7, 3  ;;  %s356_s27 = sadd.s32 %s3247_s18, %s2673_s10 }
  0x5b   : > { %p357_p8 = scmp.lt.s32.totalorder %s356_s27, 7 }
  0x5c   : > { %v2478_v60 = vrot.slane %v2854_v57, 3 }
  0x5d   : > { %s3704_s27 = smov (!%p357_p8, %s356_s27), 7 }
  0x5e   : > { %3061 = vmatmul.mubr.msk.bf16.vlgmr.msra.gmra.mrb[36].mxu1 %vm383_vm1, %v3211_v2  ;;  %v2480_v62 = vsel %vm1025_vm4, %v2478_v60, %v2479_v38  ;;  %s3133_s18 = smul.u32 24, %s3704_s27 }
  0x5f   : > { %3071 = vmatpush3.bf16.msra.mxu1 %v2074_v6  ;;  %3072 = vmatprep.mubr.msk.bf16.mxu1 %vm383_vm1, %v3215_v10 }
  0x60   : > { %3055 = vmatmul.mubr.msk.bf16.vlgmr.msra.gmra.mrb[36].mxu0 %vm383_vm1, %v3209_v4  ;;  %3129 = vmatprep.subr.msk.bf16.mxu1 %vm390_vm0, %v2834_v20  ;;  %s361_s30 = scalar_lea.vmem %s3688_s5, %s3133_s18 }
  0x61   : > { %3065 = vmatpush3.bf16.msra.mxu0 %v2000_v5  ;;  %3066 = vmatprep.mubr.msk.bf16.mxu0 %vm383_vm1, %v1989_v9 }
  0x62   : > { %3128 = vmatprep.subr.msk.bf16.mxu0 %vm390_vm0, %v2825_v14 }
  0x66   : > { %3073 = vmatmul.mubr.msk.bf16.vlgmr.msra.gmra.mrb[40].mxu1 %vm383_vm1, %v3216_v26 }
  0x67   : > { %3083 = vmatpush3.bf16.msra.mxu1 %v2239_v28  ;;  %3084 = vmatprep.mubr.msk.bf16.mxu1 %vm383_vm1, %v2228_v36 }
  0x68   : > { %3067 = vmatmul.mubr.msk.bf16.vlgmr.msra.gmra.mrb[40].mxu0 %vm383_vm1, %v1992_v32  ;;  %3131 = vmatprep.subr.msk.bf16.mxu1 %vm390_vm0, %v2848_v46 }
  0x69   : > { %3077 = vmatpush3.bf16.msra.mxu0 %v2148_v33  ;;  %3078 = vmatprep.mubr.msk.bf16.mxu0 %vm383_vm1, %v3217_v18 }
  0x6a   : > { %3130 = vmatprep.subr.msk.bf16.mxu0 %vm390_vm0, %v2839_v41 }
  0x6e   : > { %3085 = vmatmul.mubr.msk.bf16.vlgmr.msra.gmra.mrb[44].mxu1 %vm383_vm1, %v2231_v49 }
  0x6f   : > { %3095 = vmatpush3.bf16.msra.mxu1 %v2419_v54  ;;  %3096 = vmatprep.mubr.msk.bf16.mxu1 %vm383_vm1, %v2411_v59 }
  0x70   : > { %3079 = vmatmul.mubr.msk.bf16.vlgmr.msra.gmra.mrb[44].mxu0 %vm383_vm1, %v3218_v53 }
  0x71   : > { %3089 = vmatpush3.bf16.msra.mxu0 %v2326_v55  ;;  %3090 = vmatprep.mubr.msk.bf16.mxu0 %vm383_vm1, %v2318_v56 }
  0x72   : > { %3132 = vmatprep.subr.msk.bf16.mxu0 %vm390_vm0, %v2853_v58 }
  0x76   : > { %3097 = vmatmul.mubr.msk.bf16.vlgmr.msra.gmra.mrb[48].mxu1 %vm383_vm1, %v2410_v51 }
  0x78   : > { %3091 = vmatmul.mubr.msk.bf16.vlgmr.msra.gmra.mrb[48].mxu0 %vm383_vm1, %v2317_v48 }
  0x79   : > { %3101 = vmatpush3.bf16.msra.mxu0 %v2488_v61  ;;  %3102 = vmatprep.mubr.msk.bf16.mxu0 %vm383_vm1, %v2480_v62 }
  0x80   : > { %3103 = vmatmul.mubr.msk.bf16.vlgmr.msra.gmra.mrb[52].mxu0 %vm383_vm1, %v2479_v38 }
  0xe9   : > { %v2948_v63 = vpop.f32.mrb[0].mxu0  ;;  %v2954_v0 = vpop.f32.mrb[0].mxu1 }
  0xea   : > { %v428_v1 = vpop.f32.mrb[1].mxu0  ;;  %v502_v2 = vadd.f32 %v2954_v0, %v2948_v63  ;;  %v493_v3 = vpop.f32.mrb[1].mxu1 }
  0xeb   : > { %v2949_v4 = vpop.f32.mrb[2].mxu0  ;;  %v494_v5 = vadd.f32 %v493_v3, %v428_v1  ;;  %v2955_v6 = vpop.f32.mrb[2].mxu1 }
  0xec   : > { %v431_v7 = vpop.f32.mrb[3].mxu0  ;;  %v496_v8 = vpop.f32.mrb[3].mxu1 }
  0xed   : > { %v497_v9 = vadd.f32 %v496_v8, %v431_v7 }
  0xf1   : > { %v2966_v10 = vpop.f32.mrb[4].mxu1 }
  0xf2   : > { %v656_v12 = vpop.f32.mrb[5].mxu1 }
  0xf3   : > { %v2960_v11 = vpop.f32.mrb[4].mxu0  ;;  %v2967_v16 = vpop.f32.mrb[6].mxu1 }
  0xf4   : > { %v598_v13 = vadd.f32 %v2960_v11, %v502_v2  ;;  %v582_v14 = vpop.f32.mrb[5].mxu0  ;;  %v659_v20 = vpop.f32.mrb[7].mxu1 }
  0xf5   : > { %v596_v17 = vadd.f32 %v582_v14, %v494_v5  ;;  %v2961_v19 = vpop.f32.mrb[6].mxu0 }
  0xf6   : > { %v672_v21 = vadd.f32 %v2966_v10, %v598_v13  ;;  %v585_v22 = vpop.f32.mrb[7].mxu0 }
  0xf7   : > { %v597_v15 = vadd.f32 %v585_v22, %v497_v9  ;;  %v670_v23 = vadd.f32 %v656_v12, %v596_v17 }
  0xf9   : > { %v671_v24 = vadd.f32 %v659_v20, %v597_v15  ;;  %v2978_v25 = vpop.f32.mrb[8].mxu1 }
  0xfa   : > { %v821_v27 = vpop.f32.mrb[9].mxu1 }
  0xfb   : > { %v2972_v26 = vpop.f32.mrb[8].mxu0  ;;  %v2979_v31 = vpop.f32.mrb[10].mxu1 }
  0xfc   : > { %v746_v29 = vadd.f32 %v2972_v26, %v672_v21  ;;  %v730_v30 = vpop.f32.mrb[9].mxu0  ;;  %v824_v28 = vpop.f32.mrb[11].mxu1 }
  0xfd   : > { %v744_v32 = vadd.f32 %v730_v30, %v670_v23  ;;  %v2973_v33 = vpop.f32.mrb[10].mxu0 }
  0xfe   : > { %v837_v18 = vadd.f32 %v2978_v25, %v746_v29  ;;  %v733_v34 = vpop.f32.mrb[11].mxu0 }
  0xff   : > { %v745_v35 = vadd.f32 %v733_v34, %v671_v24  ;;  %v835_v36 = vadd.f32 %v821_v27, %v744_v32 }
 0x101   : > { %v836_v37 = vadd.f32 %v824_v28, %v745_v35  ;;  %v2990_v39 = vpop.f32.mrb[12].mxu1 }
 0x102   : > { %v1002_v41 = vpop.f32.mrb[13].mxu1 }
 0x103   : > { %v2984_v40 = vpop.f32.mrb[12].mxu0  ;;  %v2991_v44 = vpop.f32.mrb[14].mxu1 }
 0x104   : > { %v925_v42 = vadd.f32 %v2984_v40, %v837_v18  ;;  %v909_v43 = vpop.f32.mrb[13].mxu0  ;;  %v1005_v47 = vpop.f32.mrb[15].mxu1 }
 0x105   : > { %v923_v45 = vadd.f32 %v909_v43, %v835_v36  ;;  %v2985_v46 = vpop.f32.mrb[14].mxu0 }
 0x106   : > { %v1018_v48 = vadd.f32 %v2990_v39, %v925_v42  ;;  %v912_v49 = vpop.f32.mrb[15].mxu0 }
 0x107   : > { %v924_v50 = vadd.f32 %v912_v49, %v836_v37  ;;  %v1016_v51 = vadd.f32 %v1002_v41, %v923_v45 }
 0x109   : > { %v1017_v52 = vadd.f32 %v1005_v47, %v924_v50  ;;  %v3002_v53 = vpop.f32.mrb[16].mxu1 }
 0x10a   : > { %v1145_v55 = vpop.f32.mrb[17].mxu1 }
 0x10b   : > { %v2996_v54 = vpop.f32.mrb[16].mxu0  ;;  %v3003_v58 = vpop.f32.mrb[18].mxu1 }
 0x10c   : > { %v1088_v56 = vadd.f32 %v2996_v54, %v1018_v48  ;;  %v1072_v57 = vpop.f32.mrb[17].mxu0  ;;  %v1148_v38 = vpop.f32.mrb[19].mxu1 }
 0x10d   : > { %v1086_v59 = vadd.f32 %v1072_v57, %v1016_v51  ;;  %v2997_v60 = vpop.f32.mrb[18].mxu0 }
 0x10e   : > { %v1161_v61 = vadd.f32 %v3002_v53, %v1088_v56  ;;  %v1075_v62 = vpop.f32.mrb[19].mxu0 }
 0x10f   : > { %v1087_v63 = vadd.f32 %v1075_v62, %v1017_v52  ;;  %v1159_v0 = vadd.f32 %v1145_v55, %v1086_v59 }
 0x111   : > { %v1160_v1 = vadd.f32 %v1148_v38, %v1087_v63  ;;  %v3014_v2 = vpop.f32.mrb[20].mxu1 }
 0x112   : > { %v1310_v4 = vpop.f32.mrb[21].mxu1 }
 0x113   : > { %v3008_v3 = vpop.f32.mrb[20].mxu0  ;;  %v3015_v7 = vpop.f32.mrb[22].mxu1 }
 0x114   : > { %v1235_v5 = vadd.f32 %v3008_v3, %v1161_v61  ;;  %v1219_v6 = vpop.f32.mrb[21].mxu0  ;;  %v1313_v10 = vpop.f32.mrb[23].mxu1 }
 0x115   : > { %v1233_v8 = vadd.f32 %v1219_v6, %v1159_v0  ;;  %v3009_v9 = vpop.f32.mrb[22].mxu0 }
 0x116   : > { %v1326_v11 = vadd.f32 %v3014_v2, %v1235_v5  ;;  %v1222_v12 = vpop.f32.mrb[23].mxu0 }
 0x117   : > { %v1234_v13 = vadd.f32 %v1222_v12, %v1160_v1  ;;  %v1324_v14 = vadd.f32 %v1310_v4, %v1233_v8 }
 0x119   : > { %v1325_v16 = vadd.f32 %v1313_v10, %v1234_v13  ;;  %v3026_v17 = vpop.f32.mrb[24].mxu1 }
 0x11a   : > { %v1458_v20 = vpop.f32.mrb[25].mxu1 }
 0x11b   : > { %v3020_v19 = vpop.f32.mrb[24].mxu0  ;;  %v3027_v15 = vpop.f32.mrb[26].mxu1 }
 0x11c   : > { %v1400_v21 = vadd.f32 %v3020_v19, %v1326_v11  ;;  %v1384_v22 = vpop.f32.mrb[25].mxu0  ;;  %v1461_v25 = vpop.f32.mrb[27].mxu1 }
 0x11d   : > { %v1398_v23 = vadd.f32 %v1384_v22, %v1324_v14  ;;  %v3021_v24 = vpop.f32.mrb[26].mxu0 }
 0x11e   : > { %v1474_v26 = vadd.f32 %v3026_v17, %v1400_v21  ;;  %v1387_v27 = vpop.f32.mrb[27].mxu0 }
 0x11f   : > { %v1399_v29 = vadd.f32 %v1387_v27, %v1325_v16  ;;  %v1472_v30 = vadd.f32 %v1458_v20, %v1398_v23 }
 0x121   : > { %v1473_v31 = vadd.f32 %v1461_v25, %v1399_v29  ;;  %v3038_v32 = vpop.f32.mrb[28].mxu1 }
 0x122   : > { %v1636_v28 = vpop.f32.mrb[29].mxu1 }
 0x123   : > { %v3032_v33 = vpop.f32.mrb[28].mxu0  ;;  %v3039_v35 = vpop.f32.mrb[30].mxu1 }
 0x124   : > { %v1565_v18 = vadd.f32 %v3032_v33, %v1474_v26  ;;  %v1549_v34 = vpop.f32.mrb[29].mxu0  ;;  %v1639_v39 = vpop.f32.mrb[31].mxu1 }
 0x125   : > { %v1563_v36 = vadd.f32 %v1549_v34, %v1472_v30  ;;  %v3033_v37 = vpop.f32.mrb[30].mxu0 }
 0x126   : > { %v1652_v40 = vadd.f32 %v3038_v32, %v1565_v18  ;;  %v1552_v41 = vpop.f32.mrb[31].mxu0 }
 0x127   : > { %v1564_v42 = vadd.f32 %v1552_v41, %v1473_v31  ;;  %v1650_v43 = vadd.f32 %v1636_v28, %v1563_v36 }
 0x129   : > { %v1651_v44 = vadd.f32 %v1639_v39, %v1564_v42  ;;  %v3050_v45 = vpop.f32.mrb[32].mxu1 }
 0x12a   : > { %v1798_v47 = vpop.f32.mrb[33].mxu1 }
 0x12b   : > { %v3044_v46 = vpop.f32.mrb[32].mxu0  ;;  %v3051_v50 = vpop.f32.mrb[34].mxu1 }
 0x12c   : > { %v1745_v48 = vadd.f32 %v3044_v46, %v1652_v40  ;;  %v1729_v49 = vpop.f32.mrb[33].mxu0  ;;  %v1801_v53 = vpop.f32.mrb[35].mxu1 }
 0x12d   : > { %v1743_v51 = vadd.f32 %v1729_v49, %v1650_v43  ;;  %v3045_v52 = vpop.f32.mrb[34].mxu0 }
 0x12e   : > { %v1814_v54 = vadd.f32 %v3050_v45, %v1745_v48  ;;  %v1732_v55 = vpop.f32.mrb[35].mxu0  ;;  %v2857_v52 = vld [vmem:[%s3687_s4] ss:$0 sm:$0xff] }
 0x12f   : > { %v1744_v56 = vadd.f32 %v1732_v55, %v1651_v44  ;;  %v1812_v57 = vadd.f32 %v1798_v47, %v1743_v51 }
 0x131   : > { %v1813_v58 = vadd.f32 %v1801_v53, %v1744_v56  ;;  %v3062_v59 = vpop.f32.mrb[36].mxu1 }
 0x132   : > { %v1945_v38 = vpop.f32.mrb[37].mxu1 }
 0x133   : > { %v3056_v60 = vpop.f32.mrb[36].mxu0  ;;  %v3063_v63 = vpop.f32.mrb[38].mxu1 }
 0x134   : > { %v1887_v61 = vadd.f32 %v3056_v60, %v1814_v54  ;;  %v1871_v62 = vpop.f32.mrb[37].mxu0  ;;  %v1948_v2 = vpop.f32.mrb[39].mxu1 }
 0x135   : > { %v1885_v0 = vadd.f32 %v1871_v62, %v1812_v57  ;;  %v3057_v1 = vpop.f32.mrb[38].mxu0 }
 0x136   : > { %v1961_v3 = vadd.f32 %v3062_v59, %v1887_v61  ;;  %v1874_v4 = vpop.f32.mrb[39].mxu0 }
 0x137   : > { %v1886_v5 = vadd.f32 %v1874_v4, %v1813_v58  ;;  %v1959_v6 = vadd.f32 %v1945_v38, %v1885_v0 }
 0x139   : > { %v1960_v7 = vadd.f32 %v1948_v2, %v1886_v5  ;;  %v3074_v8 = vpop.f32.mrb[40].mxu1 }
 0x13a   : > { %v2110_v10 = vpop.f32.mrb[41].mxu1 }
 0x13b   : > { %v3068_v9 = vpop.f32.mrb[40].mxu0  ;;  %v3075_v13 = vpop.f32.mrb[42].mxu1 }
 0x13c   : > { %v2052_v11 = vadd.f32 %v3068_v9, %v1961_v3  ;;  %v2036_v12 = vpop.f32.mrb[41].mxu0  ;;  %v2113_v17 = vpop.f32.mrb[43].mxu1 }
 0x13d   : > { %v2050_v14 = vadd.f32 %v2036_v12, %v1959_v6  ;;  %v3069_v16 = vpop.f32.mrb[42].mxu0 }
 0x13e   : > { %v2126_v19 = vadd.f32 %v3074_v8, %v2052_v11  ;;  %v2039_v20 = vpop.f32.mrb[43].mxu0 }
 0x13f   : > { %v2051_v21 = vadd.f32 %v2039_v20, %v1960_v7  ;;  %v2124_v22 = vadd.f32 %v2110_v10, %v2050_v14 }
 0x141   : > { %v2125_v15 = vadd.f32 %v2113_v17, %v2051_v21  ;;  %v3086_v23 = vpop.f32.mrb[44].mxu1 }
 0x142   : > { %v2275_v25 = vpop.f32.mrb[45].mxu1 }
 0x143   : > { %v3080_v24 = vpop.f32.mrb[44].mxu0  ;;  %v3087_v29 = vpop.f32.mrb[46].mxu1 }
 0x144   : > { %v2200_v26 = vadd.f32 %v3080_v24, %v2126_v19  ;;  %v2184_v27 = vpop.f32.mrb[45].mxu0  ;;  %v2278_v32 = vpop.f32.mrb[47].mxu1 }
 0x145   : > { %v2198_v30 = vadd.f32 %v2184_v27, %v2124_v22  ;;  %v3081_v31 = vpop.f32.mrb[46].mxu0 }
 0x146   : > { %v2291_v33 = vadd.f32 %v3086_v23, %v2200_v26  ;;  %v2187_v28 = vpop.f32.mrb[47].mxu0 }
 0x147   : > { %v2199_v18 = vadd.f32 %v2187_v28, %v2125_v15  ;;  %v2289_v34 = vadd.f32 %v2275_v25, %v2198_v30 }
 0x149   : > { %v2290_v35 = vadd.f32 %v2278_v32, %v2199_v18  ;;  %v3098_v36 = vpop.f32.mrb[48].mxu1 }
 0x14a   : > { %v2455_v39 = vpop.f32.mrb[49].mxu1 }
 0x14b   : > { %v3092_v37 = vpop.f32.mrb[48].mxu0  ;;  %v3099_v42 = vpop.f32.mrb[50].mxu1 }
 0x14c   : > { %v2378_v40 = vadd.f32 %v3092_v37, %v2291_v33  ;;  %v2362_v41 = vpop.f32.mrb[49].mxu0  ;;  %v2458_v45 = vpop.f32.mrb[51].mxu1 }
 0x14d   : > { %v2376_v43 = vadd.f32 %v2362_v41, %v2289_v34  ;;  %v3093_v44 = vpop.f32.mrb[50].mxu0 }
 0x14e   : > { %v2471_v46 = vadd.f32 %v3098_v36, %v2378_v40  ;;  %v2365_v47 = vpop.f32.mrb[51].mxu0 }
 0x14f   : > { %v2377_v48 = vadd.f32 %v2365_v47, %v2290_v35  ;;  %v2469_v49 = vadd.f32 %v2455_v39, %v2376_v43 }
 0x151   : > { %v2470_v50 = vadd.f32 %v2458_v45, %v2377_v48 }
 0x153   : > { %v3104_v51 = vpop.f32.mrb[52].mxu0 }
 0x154   : > { %v2540_v53 = vadd.f32 %v3104_v51, %v2471_v46  ;;  %v2524_v54 = vpop.f32.mrb[53].mxu0 }
 0x155   : > { %v2538_v55 = vadd.f32 %v2524_v54, %v2469_v49  ;;  %v3105_v56 = vpop.f32.mrb[54].mxu0 }
 0x156   : > { %v2550_v57 = vadd.f32 %v2857_v52, %v2540_v53  ;;  %v2527_v58 = vpop.f32.mrb[55].mxu0 }
 0x157   : > { %v2548_v59 = vadd.f32 %v2857_v52, %v2538_v55  ;;  %v2539_v60 = vadd.f32 %v2527_v58, %v2470_v50 }
 0x158   : > { %2553 = vst [vmem:[%s361_s30 + $0x10] sm:$0xff] %v2550_v57 }
 0x159   : > { %2551 = vst [vmem:[%s361_s30] sm:$0xff] %v2548_v59  ;;  %v2549_v38 = vadd.f32 %v2857_v52, %v2539_v60 }
 0x15b   : > { %2552 = vst [vmem:[%s361_s30 + $0x8] sm:$0xff] %v2549_v38 }
 0x15c PF: > { %s15_s22 = sadd.s32 1, %s3263_s22   ;;  %s3689_s18 = smov %s3255_s20 }
 0x15d   : > { %p12_p9 = scmp.ge.s32.totalorder %s15_s22, 10   ;;  %s3690_s19 = smov %s3259_s21 }
 0x15e   : > { %s3691_s20 = smov %s3694_s23  ;;  %s3692_s21 = smov %s3698_s24 }
 0x15f   :  { %14 = sbr.rel (!%p12_p9) target bundleno = 3 (0x3), region = 111 }

</bundles_post_ra>
